<compile_context>
chip_gen: v7x
topology: tpu7x:2x2x1
jax: 0.10.0
libtpu: 0.0.40
codegen_flags: <defaults>
</compile_context>

<pallas_src>
import functools
import math

import jax
import jax.numpy as jnp
from jax.experimental import pallas as pl
from jax.experimental.pallas import tpu as pltpu


# Row indices into the stacked per-channel parameter array (shape (N_ROWS, D)).
(R_MAP_B, R_ABN_S, R_ABN_T, R_CTX_B, R_BN2_S, R_BN2_T,
 R_FUSE_B1, R_FUSE_W2, R_FUSE_B2, R_FC1_B, R_FC2_B) = range(11)
N_ROWS = 11


# ----------------------------------------------------------------------------- kernel

def _text_encoder_kernel(emb_ref, map_w_ref, wqk_ref, bqk_ref, ctx_w_ref,
                         fc1_w_ref, fc2_w_ref, w1a_ref, w1b_ref, rows_ref,
                         vec_ref, tok_ref, *, T, D, heads, ctx_fc_relu):
    f32 = jnp.float32
    bf16 = jnp.bfloat16
    dk = D // heads
    scale = 1.0 / math.sqrt(dk)
    inv_T = 1.0 / T

    rows = rows_ref[...]                       # (N_ROWS, D) f32, loaded once

    def row(i):                                # per-channel parameter row -> (1, D)
        return rows[i:i + 1, :]

    def mm(a, b):                              # bf16 MXU matmul, f32 accumulation
        return jnp.dot(a.astype(bf16), b.astype(bf16), preferred_element_type=f32)

    def fnorm(v):                              # F.normalize(p=2, dim=-1), eps=1e-12
        n2 = jnp.sum(v * v, axis=-1, keepdims=True)
        return v * jax.lax.rsqrt(jnp.maximum(n2, 1e-24))

    emb = emb_ref[...]                         # (T, H) f32, one batch

    # ---- locals = l2norm(mapping(emb), dim=1): norm over the TOKEN axis (no eps,
    #      matching the PyTorch l2norm helper) ----
    loc = mm(emb, map_w_ref[...]) + row(R_MAP_B)                          # (T, D)
    locals_b = loc * jax.lax.rsqrt(jnp.sum(loc * loc, axis=0, keepdims=True))
    x = locals_b

    # ---- AGSA stand-in: MHSA (Q, K projected, V = x) + eval BatchNorm + residual ----
    # TODO(synk): AGSA internals not provided; stand-in = MHSA + BN affine + residual
    # (drop=0.0 so dropout is identity).
    qk = mm(x, wqk_ref[...]) + bqk_ref[...]                               # (T, 2D)
    head_outs = []
    for h in range(heads):
        q_h = qk[:, h * dk:(h + 1) * dk]                                  # (T, dk)
        k_h = qk[:, D + h * dk:D + (h + 1) * dk]                          # (T, dk)
        v_h = x[:, h * dk:(h + 1) * dk]                                   # (T, dk)
        s = jax.lax.dot_general(q_h.astype(bf16), k_h.astype(bf16),
                                (((1,), (1,)), ((), ())),
                                preferred_element_type=f32) * scale       # (T, T)
        s = s - jnp.max(s, axis=-1, keepdims=True)
        e = jnp.exp(s)
        p = e * pl.reciprocal(jnp.sum(e, axis=-1, keepdims=True), approx=True)
        head_outs.append(mm(p, v_h))                                      # (T, dk)
    attn = jnp.concatenate(head_outs, axis=-1)                            # (T, D)
    agsa_emb = x + attn * row(R_ABN_S) + row(R_ABN_T)

    # ---- context / gating path ----
    glo_fea = jnp.sum(agsa_emb, axis=0, keepdims=True) * inv_T            # (1, D)
    atd = mm(glo_fea, ctx_w_ref[...]) + row(R_CTX_B)                      # ctx_fc + bn1
    agsa1 = agsa_emb * row(R_BN2_S) + row(R_BN2_T)                        # bn2 affine
    if ctx_fc_relu:
        atd = jnp.maximum(atd, 0.0)
        agsa1 = jnp.maximum(agsa1, 0.0)

    # fusion gate: Linear(2D->D)+ReLU, then Linear(D->1)+sigmoid (VPU dot/reduce)
    fh = jnp.maximum(mm(glo_fea, w1a_ref[...]) + mm(atd, w1b_ref[...])
                     + row(R_FUSE_B1), 0.0)                               # (1, D)
    logit = (jnp.sum(fh * row(R_FUSE_W2), axis=-1, keepdims=True)
             + row(R_FUSE_B2)[:, :1])                                     # (1, 1)
    g = pl.reciprocal(1.0 + jnp.exp(-logit), approx=True)
    ctx = g * glo_fea + (1.0 - g) * atd

    # ---- feed-forward (fc2 + bn folded) + residual + token mean ----
    h1 = jnp.maximum(mm(agsa_emb, fc1_w_ref[...]) + row(R_FC1_B), 0.0)
    ff = mm(h1, fc2_w_ref[...]) + row(R_FC2_B)
    cap = jnp.sum(agsa_emb + ff, axis=0, keepdims=True) * inv_T           # (1, D)

    # ---- packed writebacks: one (3, D) block + one (4, T, D) block per batch ----
    vec_ref[0:1, :] = fnorm(cap)        # F.normalize(cap_emb)
    vec_ref[1:2, :] = fnorm(atd)        # F.normalize(atd_glo_fea)
    vec_ref[2:3, :] = fnorm(ctx)        # F.normalize(cap_ctx_fea)
    tok_ref[0] = fnorm(locals_b)        # F.normalize(locals)
    tok_ref[1] = fnorm(agsa1)           # F.normalize(agsa_emb1)
    tok_ref[2] = locals_b               # locals
    tok_ref[3] = agsa_emb               # agsa_emb


# ----------------------------------------------------------------------------- params

def init_params(key, *, vocab=50, type_vocab=2, max_pos=64,
                hidden=32, embed=32, head=2):
    keys = jax.random.split(key, 16)

    def lin(k, din, dout):
        kw, kb = jax.random.split(k)
        r = 1.0 / math.sqrt(din)
        w = jax.random.uniform(kw, (din, dout), jnp.float32, -r, r)
        b = jax.random.uniform(kb, (dout,), jnp.float32, -r, r)
        return w, b

    p = {"embed_size": embed, "hidden": hidden, "head": head}

    # BERT stand-in embedding tables (BERT-style N(0, 0.02) init)
    p["word_emb"] = 0.02 * jax.random.normal(keys[0], (vocab, hidden), jnp.float32)
    p["type_emb"] = 0.02 * jax.random.normal(keys[1], (type_vocab, hidden), jnp.float32)
    p["pos_emb"] = 0.02 * jax.random.normal(keys[2], (max_pos, hidden), jnp.float32)

    # mapping: Xavier-uniform weight, zero bias (TextEncoder.init_weights)
    r = math.sqrt(6.0) / math.sqrt(hidden + embed)
    p["map_w"] = jax.random.uniform(keys[3], (hidden, embed), jnp.float32, -r, r)
    p["map_b"] = jnp.zeros((embed,), jnp.float32)

    p["agsa_wq"], p["agsa_bq"] = lin(keys[4], embed, embed)
    p["agsa_wk"], p["agsa_bk"] = lin(keys[5], embed, embed)
    p["ctx_w"], p["ctx_b"] = lin(keys[6], embed, embed)
    p["fc1_w"], p["fc1_b"] = lin(keys[7], embed, embed)
    p["fc2_w"], p["fc2_b"] = lin(keys[8], embed, embed)
    p["fuse_w1"], p["fuse_b1"] = lin(keys[9], 2 * embed, embed)
    p["fuse_w2"], p["fuse_b2"] = lin(keys[10], embed, 1)

    for name in ("agsa_bn", "bn", "bn1", "bn2"):   # PyTorch BN default init
        p[name + "_g"] = jnp.ones((embed,), jnp.float32)
        p[name + "_b"] = jnp.zeros((embed,), jnp.float32)
        p[name + "_m"] = jnp.zeros((embed,), jnp.float32)
        p[name + "_v"] = jnp.ones((embed,), jnp.float32)
    return p


def fuse_params(p, eps=1e-5):
    """Fold eval BatchNorms into weights, merge Wq||Wk, bf16-cast matmul weights,
    stack per-channel parameter rows into one lane-dense (N_ROWS, D) f32 array."""
    D = p["embed_size"]
    bf16 = jnp.bfloat16

    def bn_affine(name):
        s = p[name + "_g"] / jnp.sqrt(p[name + "_v"] + eps)
        t = p[name + "_b"] - p[name + "_m"] * s
        return s, t

    abn_s, abn_t = bn_affine("agsa_bn")   # attention-output BN (in-kernel affine)
    bn1_s, bn1_t = bn_affine("bn1")       # ctx_fc_bn1 (folded into ctx_fc)
    bn2_s, bn2_t = bn_affine("bn2")       # ctx_fc_bn2 (in-kernel affine)
    bn_s, bn_t = bn_affine("bn")          # self.bn    (folded into fc2)

    fp = {"embed_size": D, "hidden": p["hidden"], "head": p["head"],
          "word_emb": p["word_emb"], "type_emb": p["type_emb"], "pos_emb": p["pos_emb"],
          # matmul weights pre-cast to bf16 (MXU-native on v5e/v6e/v7x); f32 accumulate
          "map_w": p["map_w"].astype(bf16),
          "wqk": jnp.concatenate([p["agsa_wq"], p["agsa_wk"]], axis=1).astype(bf16),
          "bqk": jnp.concatenate([p["agsa_bq"], p["agsa_bk"]])[None, :],     # (1, 2D) f32
          "ctx_wf": (p["ctx_w"] * bn1_s[None, :]).astype(bf16),
          "fc1_w": p["fc1_w"].astype(bf16),
          "fc2_wf": (p["fc2_w"] * bn_s[None, :]).astype(bf16),
          "fuse_w1a": p["fuse_w1"][:D, :].astype(bf16),
          "fuse_w1b": p["fuse_w1"][D:, :].astype(bf16)}

    rows = jnp.stack([
        p["map_b"],                        # R_MAP_B
        abn_s, abn_t,                      # R_ABN_S, R_ABN_T
        p["ctx_b"] * bn1_s + bn1_t,        # R_CTX_B
        bn2_s, bn2_t,                      # R_BN2_S, R_BN2_T
        p["fuse_b1"],                      # R_FUSE_B1
        p["fuse_w2"][:, 0],                # R_FUSE_W2
        jnp.full((D,), p["fuse_b2"][0]),   # R_FUSE_B2 (broadcast scalar)
        p["fc1_b"],                        # R_FC1_B
        p["fc2_b"] * bn_s + bn_t,          # R_FC2_B
    ], axis=0).astype(jnp.float32)         # (N_ROWS, D)
    fp["rows"] = rows
    return fp


# ----------------------------------------------------------------------------- forward

def text_encoder_forward(fp, input_ids, attention_mask, token_type_ids,
                         lengths, ctx_fc_relu):
    bs, T = input_ids.shape
    D, H, heads = fp["embed_size"], fp["hidden"], fp["head"]

    # TODO(synk): frozen pretrained BERT replaced by a deterministic embedding-lookup
    # stand-in (word + position + token_type); attention_mask / lengths are accepted
    # but unused, so padding tokens participate in softmax and token means.
    pos = jnp.arange(T)
    emb = (fp["word_emb"][input_ids] + fp["type_emb"][token_type_ids]
           + fp["pos_emb"][pos][None, :, :]).astype(jnp.float32)          # (bs, T, H)

    kern = functools.partial(_text_encoder_kernel, T=T, D=D, heads=heads,
                             ctx_fc_relu=bool(ctx_fc_relu))

    def const_spec(shape):                 # same block for every grid step (no re-DMA)
        zeros = (0,) * len(shape)
        return pl.BlockSpec(shape, lambda b, z=zeros: z)

    in_specs = [
        pl.BlockSpec((None, T, H), lambda b: (b, 0, 0)),   # emb: one batch per step
        const_spec((H, D)),          # map_w
        const_spec((D, 2 * D)),      # wqk (merged Wq||Wk)
        const_spec((1, 2 * D)),      # bqk
        const_spec((D, D)),          # ctx_fc (+bn1 folded)
        const_spec((D, D)),          # fc1
        const_spec((D, D)),          # fc2 (+bn folded)
        const_spec((D, D)),          # fusion w1 (glo half)
        const_spec((D, D)),          # fusion w1 (atd half)
        const_spec((N_ROWS, D)),     # stacked per-channel rows
    ]
    out_specs = [
        pl.BlockSpec((None, 3, D), lambda b: (b, 0, 0)),        # capn | atdn | ctxn
        pl.BlockSpec((None, 4, T, D), lambda b: (b, 0, 0, 0)),  # localsn|agsa1n|locals|agsa
    ]
    out_shape = (
        jax.ShapeDtypeStruct((bs, 3, D), jnp.float32),
        jax.ShapeDtypeStruct((bs, 4, T, D), jnp.float32),
    )

    vec, tok = pl.pallas_call(
        kern,
        grid=(bs,),
        in_specs=in_specs,
        out_specs=out_specs,
        out_shape=out_shape,
        compiler_params=pltpu.CompilerParams(
            dimension_semantics=("parallel",),        # megacore / v7x 2-TC sharding
            vmem_limit_bytes=32 * 1024 * 1024),
    )(emb, fp["map_w"], fp["wqk"], fp["bqk"], fp["ctx_wf"], fp["fc1_w"],
      fp["fc2_wf"], fp["fuse_w1a"], fp["fuse_w1b"], fp["rows"])

    capn, atdn, ctxn = vec[:, 0, :], vec[:, 1, :], vec[:, 2, :]
    localsn, agsa1n, locals_, agsa_emb = tok[:, 0], tok[:, 1], tok[:, 2], tok[:, 3]
    # PyTorch return order:
    # (F.normalize(cap_emb), F.normalize(locals), F.normalize(atd_glo_fea),
    #  F.normalize(agsa_emb1), F.normalize(cap_ctx_fea), locals, agsa_emb)
    return capn, localsn, atdn, agsa1n, ctxn, locals_, agsa_emb


# ----------------------------------------------------------------------------- main

if __name__ == "__main__":
    key = jax.random.PRNGKey(0)
    pkey, ikey = jax.random.split(key)

    bs, T = 2, 8
    params = init_params(pkey, vocab=50, type_vocab=2, max_pos=64,
                         hidden=32, embed=32, head=2)
    fused = fuse_params(params)

    input_ids = jax.random.randint(ikey, (bs, T), 0, 50, dtype=jnp.int32)
    attention_mask = jnp.ones((bs, T), jnp.int32)
    token_type_ids = jnp.zeros((bs, T), jnp.int32)
    lengths = jnp.full((bs,), T, jnp.int32)

    outs = text_encoder_forward(fused, input_ids, attention_mask,
                                token_type_ids, lengths, ctx_fc_relu=True)
    for o in outs:
        jax.block_until_ready(o)

    print("KERNEL_OK")
</pallas_src>

<mosaic_0001>
module attributes {stable_mosaic.version = 11 : i64} {
  func.func @_text_encoder_kernel(%arg0: i32, %arg1: memref<1x8x32xf32, #tpu.memory_space<vmem>>, %arg2: memref<32x32xbf16, #tpu.memory_space<vmem>>, %arg3: memref<32x64xbf16, #tpu.memory_space<vmem>>, %arg4: memref<1x64xf32, #tpu.memory_space<vmem>>, %arg5: memref<32x32xbf16, #tpu.memory_space<vmem>>, %arg6: memref<32x32xbf16, #tpu.memory_space<vmem>>, %arg7: memref<32x32xbf16, #tpu.memory_space<vmem>>, %arg8: memref<32x32xbf16, #tpu.memory_space<vmem>>, %arg9: memref<32x32xbf16, #tpu.memory_space<vmem>>, %arg10: memref<11x32xf32, #tpu.memory_space<vmem>>, %arg11: memref<1x3x32xf32, #tpu.memory_space<vmem>>, %arg12: memref<1x4x8x32xf32, #tpu.memory_space<vmem>>) attributes {dimension_semantics = [#tpu.dimension_semantics<parallel>], iteration_bounds = array<i64: 2>, scalar_prefetch = 0 : i64, scratch_operands = 0 : i64, tpu.core_type = #tpu.core_type<tc>, window_params = [{transform_indices = @transform_0, window_bounds = array<i64: 1, 8, 32>}, {pipeline_mode = #tpu.pipeline_mode<synchronous>, transform_indices = @transform_1, window_bounds = array<i64: 32, 32>}, {pipeline_mode = #tpu.pipeline_mode<synchronous>, transform_indices = @transform_2, window_bounds = array<i64: 32, 64>}, {pipeline_mode = #tpu.pipeline_mode<synchronous>, transform_indices = @transform_3, window_bounds = array<i64: 1, 64>}, {pipeline_mode = #tpu.pipeline_mode<synchronous>, transform_indices = @transform_4, window_bounds = array<i64: 32, 32>}, {pipeline_mode = #tpu.pipeline_mode<synchronous>, transform_indices = @transform_5, window_bounds = array<i64: 32, 32>}, {pipeline_mode = #tpu.pipeline_mode<synchronous>, transform_indices = @transform_6, window_bounds = array<i64: 32, 32>}, {pipeline_mode = #tpu.pipeline_mode<synchronous>, transform_indices = @transform_7, window_bounds = array<i64: 32, 32>}, {pipeline_mode = #tpu.pipeline_mode<synchronous>, transform_indices = @transform_8, window_bounds = array<i64: 32, 32>}, {pipeline_mode = #tpu.pipeline_mode<synchronous>, transform_indices = @transform_9, window_bounds = array<i64: 11, 32>}, {transform_indices = @transform_10, window_bounds = array<i64: 1, 3, 32>}, {transform_indices = @transform_11, window_bounds = array<i64: 1, 4, 8, 32>}]} {
    %c0 = arith.constant 0 : index
    %c0_0 = arith.constant 0 : index
    %0 = vector.load %arg10[%c0, %c0_0] : memref<11x32xf32, #tpu.memory_space<vmem>>, vector<11x32xf32>
    %c0_1 = arith.constant 0 : index
    %c0_2 = arith.constant 0 : index
    %c0_3 = arith.constant 0 : index
    %1 = vector.load %arg1[%c0_1, %c0_2, %c0_3] : memref<1x8x32xf32, #tpu.memory_space<vmem>>, vector<1x8x32xf32>
    %2 = vector.shape_cast %1 : vector<1x8x32xf32> to vector<8x32xf32>
    %c0_4 = arith.constant 0 : index
    %c0_5 = arith.constant 0 : index
    %3 = vector.load %arg2[%c0_4, %c0_5] : memref<32x32xbf16, #tpu.memory_space<vmem>>, vector<32x32xbf16>
    %4 = arith.truncf %2 : vector<8x32xf32> to vector<8x32xbf16>
    %cst = arith.constant dense<0.000000e+00> : vector<8x32xf32>
    %5 = tpu.matmul %4, %3, %cst {dimension_numbers = #tpu.dot_dimension_numbers<[1], [0], [0], [1], [0, 0, 1, 1], [], []>} : vector<8x32xbf16>, vector<32x32xbf16>, vector<8x32xf32> -> vector<8x32xf32>
    %6 = vector.extract_strided_slice %0 {offsets = [0, 0], sizes = [1, 32], strides = [1, 1]} : vector<11x32xf32> to vector<1x32xf32>
    %7 = vector.broadcast %6 : vector<1x32xf32> to vector<8x32xf32>
    %8 = arith.addf %5, %7 : vector<8x32xf32>
    %9 = arith.mulf %8, %8 : vector<8x32xf32>
    %cst_6 = arith.constant dense<0.000000e+00> : vector<32xf32>
    %10 = vector.multi_reduction <add>, %9, %cst_6 [0] : vector<8x32xf32> to vector<32xf32>
    %11 = vector.shape_cast %10 : vector<32xf32> to vector<1x32xf32>
    %12 = math.rsqrt %11 : vector<1x32xf32>
    %13 = vector.broadcast %12 : vector<1x32xf32> to vector<8x32xf32>
    %14 = arith.mulf %8, %13 : vector<8x32xf32>
    %c0_7 = arith.constant 0 : index
    %c0_8 = arith.constant 0 : index
    %15 = vector.load %arg3[%c0_7, %c0_8] : memref<32x64xbf16, #tpu.memory_space<vmem>>, vector<32x64xbf16>
    %16 = arith.truncf %14 : vector<8x32xf32> to vector<8x32xbf16>
    %cst_9 = arith.constant dense<0.000000e+00> : vector<8x64xf32>
    %17 = tpu.matmul %16, %15, %cst_9 {dimension_numbers = #tpu.dot_dimension_numbers<[1], [0], [0], [1], [0, 0, 1, 1], [], []>} : vector<8x32xbf16>, vector<32x64xbf16>, vector<8x64xf32> -> vector<8x64xf32>
    %c0_10 = arith.constant 0 : index
    %c0_11 = arith.constant 0 : index
    %18 = vector.load %arg4[%c0_10, %c0_11] : memref<1x64xf32, #tpu.memory_space<vmem>>, vector<1x64xf32>
    %19 = vector.broadcast %18 : vector<1x64xf32> to vector<8x64xf32>
    %20 = arith.addf %17, %19 : vector<8x64xf32>
    %21 = vector.extract_strided_slice %20 {offsets = [0, 0], sizes = [8, 16], strides = [1, 1]} : vector<8x64xf32> to vector<8x16xf32>
    %22 = vector.extract_strided_slice %20 {offsets = [0, 32], sizes = [8, 16], strides = [1, 1]} : vector<8x64xf32> to vector<8x16xf32>
    %23 = vector.extract_strided_slice %14 {offsets = [0, 0], sizes = [8, 16], strides = [1, 1]} : vector<8x32xf32> to vector<8x16xf32>
    %24 = arith.truncf %21 : vector<8x16xf32> to vector<8x16xbf16>
    %25 = arith.truncf %22 : vector<8x16xf32> to vector<8x16xbf16>
    %cst_12 = arith.constant dense<0.000000e+00> : vector<8x8xf32>
    %26 = tpu.matmul %24, %25, %cst_12 {dimension_numbers = #tpu.dot_dimension_numbers<[1], [1], [0], [0], [0, 0, 1, 0], [], []>} : vector<8x16xbf16>, vector<8x16xbf16>, vector<8x8xf32> -> vector<8x8xf32>
    %cst_13 = arith.constant 2.500000e-01 : f32
    %27 = vector.broadcast %cst_13 : f32 to vector<8x8xf32>
    %28 = arith.mulf %26, %27 : vector<8x8xf32>
    %cst_14 = arith.constant dense<0xFF800000> : vector<8xf32>
    %29 = vector.multi_reduction <maximumf>, %28, %cst_14 [1] : vector<8x8xf32> to vector<8xf32>
    %30 = vector.shape_cast %29 : vector<8xf32> to vector<8x1xf32>
    %31 = vector.broadcast %30 : vector<8x1xf32> to vector<8x8xf32>
    %32 = arith.subf %28, %31 : vector<8x8xf32>
    %33 = math.exp %32 : vector<8x8xf32>
    %cst_15 = arith.constant dense<0.000000e+00> : vector<8xf32>
    %34 = vector.multi_reduction <add>, %33, %cst_15 [1] : vector<8x8xf32> to vector<8xf32>
    %35 = vector.shape_cast %34 : vector<8xf32> to vector<8x1xf32>
    %36 = tpu.reciprocal %35 {approx = true} : vector<8x1xf32> -> vector<8x1xf32>
    %37 = vector.broadcast %36 : vector<8x1xf32> to vector<8x8xf32>
    %38 = arith.mulf %33, %37 : vector<8x8xf32>
    %39 = arith.truncf %38 : vector<8x8xf32> to vector<8x8xbf16>
    %40 = arith.truncf %23 : vector<8x16xf32> to vector<8x16xbf16>
    %cst_16 = arith.constant dense<0.000000e+00> : vector<8x16xf32>
    %41 = tpu.matmul %39, %40, %cst_16 {dimension_numbers = #tpu.dot_dimension_numbers<[1], [0], [0], [1], [0, 0, 1, 1], [], []>} : vector<8x8xbf16>, vector<8x16xbf16>, vector<8x16xf32> -> vector<8x16xf32>
    %42 = vector.extract_strided_slice %20 {offsets = [0, 16], sizes = [8, 16], strides = [1, 1]} : vector<8x64xf32> to vector<8x16xf32>
    %43 = vector.extract_strided_slice %20 {offsets = [0, 48], sizes = [8, 16], strides = [1, 1]} : vector<8x64xf32> to vector<8x16xf32>
    %44 = vector.extract_strided_slice %14 {offsets = [0, 16], sizes = [8, 16], strides = [1, 1]} : vector<8x32xf32> to vector<8x16xf32>
    %45 = arith.truncf %42 : vector<8x16xf32> to vector<8x16xbf16>
    %46 = arith.truncf %43 : vector<8x16xf32> to vector<8x16xbf16>
    %cst_17 = arith.constant dense<0.000000e+00> : vector<8x8xf32>
    %47 = tpu.matmul %45, %46, %cst_17 {dimension_numbers = #tpu.dot_dimension_numbers<[1], [1], [0], [0], [0, 0, 1, 0], [], []>} : vector<8x16xbf16>, vector<8x16xbf16>, vector<8x8xf32> -> vector<8x8xf32>
    %cst_18 = arith.constant 2.500000e-01 : f32
    %48 = vector.broadcast %cst_18 : f32 to vector<8x8xf32>
    %49 = arith.mulf %47, %48 : vector<8x8xf32>
    %cst_19 = arith.constant dense<0xFF800000> : vector<8xf32>
    %50 = vector.multi_reduction <maximumf>, %49, %cst_19 [1] : vector<8x8xf32> to vector<8xf32>
    %51 = vector.shape_cast %50 : vector<8xf32> to vector<8x1xf32>
    %52 = vector.broadcast %51 : vector<8x1xf32> to vector<8x8xf32>
    %53 = arith.subf %49, %52 : vector<8x8xf32>
    %54 = math.exp %53 : vector<8x8xf32>
    %cst_20 = arith.constant dense<0.000000e+00> : vector<8xf32>
    %55 = vector.multi_reduction <add>, %54, %cst_20 [1] : vector<8x8xf32> to vector<8xf32>
    %56 = vector.shape_cast %55 : vector<8xf32> to vector<8x1xf32>
    %57 = tpu.reciprocal %56 {approx = true} : vector<8x1xf32> -> vector<8x1xf32>
    %58 = vector.broadcast %57 : vector<8x1xf32> to vector<8x8xf32>
    %59 = arith.mulf %54, %58 : vector<8x8xf32>
    %60 = arith.truncf %59 : vector<8x8xf32> to vector<8x8xbf16>
    %61 = arith.truncf %44 : vector<8x16xf32> to vector<8x16xbf16>
    %cst_21 = arith.constant dense<0.000000e+00> : vector<8x16xf32>
    %62 = tpu.matmul %60, %61, %cst_21 {dimension_numbers = #tpu.dot_dimension_numbers<[1], [0], [0], [1], [0, 0, 1, 1], [], []>} : vector<8x8xbf16>, vector<8x16xbf16>, vector<8x16xf32> -> vector<8x16xf32>
    %63 = tpu.concatenate %41, %62 in 1 : vector<8x16xf32>, vector<8x16xf32> -> vector<8x32xf32>
    %64 = vector.extract_strided_slice %0 {offsets = [1, 0], sizes = [1, 32], strides = [1, 1]} : vector<11x32xf32> to vector<1x32xf32>
    %65 = vector.broadcast %64 : vector<1x32xf32> to vector<8x32xf32>
    %66 = arith.mulf %63, %65 : vector<8x32xf32>
    %67 = arith.addf %14, %66 : vector<8x32xf32>
    %68 = vector.extract_strided_slice %0 {offsets = [2, 0], sizes = [1, 32], strides = [1, 1]} : vector<11x32xf32> to vector<1x32xf32>
    %69 = vector.broadcast %68 : vector<1x32xf32> to vector<8x32xf32>
    %70 = arith.addf %67, %69 : vector<8x32xf32>
    %cst_22 = arith.constant dense<0.000000e+00> : vector<32xf32>
    %71 = vector.multi_reduction <add>, %70, %cst_22 [0] : vector<8x32xf32> to vector<32xf32>
    %72 = vector.shape_cast %71 : vector<32xf32> to vector<1x32xf32>
    %cst_23 = arith.constant 1.250000e-01 : f32
    %73 = vector.broadcast %cst_23 : f32 to vector<1x32xf32>
    %74 = arith.mulf %72, %73 : vector<1x32xf32>
    %c0_24 = arith.constant 0 : index
    %c0_25 = arith.constant 0 : index
    %75 = vector.load %arg5[%c0_24, %c0_25] : memref<32x32xbf16, #tpu.memory_space<vmem>>, vector<32x32xbf16>
    %76 = arith.truncf %74 : vector<1x32xf32> to vector<1x32xbf16>
    %cst_26 = arith.constant dense<0.000000e+00> : vector<1x32xf32>
    %77 = tpu.matmul %76, %75, %cst_26 {dimension_numbers = #tpu.dot_dimension_numbers<[1], [0], [0], [1], [0, 0, 1, 1], [], []>} : vector<1x32xbf16>, vector<32x32xbf16>, vector<1x32xf32> -> vector<1x32xf32>
    %78 = vector.extract_strided_slice %0 {offsets = [3, 0], sizes = [1, 32], strides = [1, 1]} : vector<11x32xf32> to vector<1x32xf32>
    %79 = arith.addf %77, %78 : vector<1x32xf32>
    %80 = vector.extract_strided_slice %0 {offsets = [4, 0], sizes = [1, 32], strides = [1, 1]} : vector<11x32xf32> to vector<1x32xf32>
    %81 = vector.broadcast %80 : vector<1x32xf32> to vector<8x32xf32>
    %82 = arith.mulf %70, %81 : vector<8x32xf32>
    %83 = vector.extract_strided_slice %0 {offsets = [5, 0], sizes = [1, 32], strides = [1, 1]} : vector<11x32xf32> to vector<1x32xf32>
    %84 = vector.broadcast %83 : vector<1x32xf32> to vector<8x32xf32>
    %85 = arith.addf %82, %84 : vector<8x32xf32>
    %cst_27 = arith.constant 0.000000e+00 : f32
    %86 = vector.broadcast %cst_27 : f32 to vector<1x32xf32>
    %87 = arith.maximumf %79, %86 : vector<1x32xf32>
    %cst_28 = arith.constant 0.000000e+00 : f32
    %88 = vector.broadcast %cst_28 : f32 to vector<8x32xf32>
    %89 = arith.maximumf %85, %88 : vector<8x32xf32>
    %c0_29 = arith.constant 0 : index
    %c0_30 = arith.constant 0 : index
    %90 = vector.load %arg8[%c0_29, %c0_30] : memref<32x32xbf16, #tpu.memory_space<vmem>>, vector<32x32xbf16>
    %91 = arith.truncf %74 : vector<1x32xf32> to vector<1x32xbf16>
    %cst_31 = arith.constant dense<0.000000e+00> : vector<1x32xf32>
    %92 = tpu.matmul %91, %90, %cst_31 {dimension_numbers = #tpu.dot_dimension_numbers<[1], [0], [0], [1], [0, 0, 1, 1], [], []>} : vector<1x32xbf16>, vector<32x32xbf16>, vector<1x32xf32> -> vector<1x32xf32>
    %c0_32 = arith.constant 0 : index
    %c0_33 = arith.constant 0 : index
    %93 = vector.load %arg9[%c0_32, %c0_33] : memref<32x32xbf16, #tpu.memory_space<vmem>>, vector<32x32xbf16>
    %94 = arith.truncf %87 : vector<1x32xf32> to vector<1x32xbf16>
    %cst_34 = arith.constant dense<0.000000e+00> : vector<1x32xf32>
    %95 = tpu.matmul %94, %93, %cst_34 {dimension_numbers = #tpu.dot_dimension_numbers<[1], [0], [0], [1], [0, 0, 1, 1], [], []>} : vector<1x32xbf16>, vector<32x32xbf16>, vector<1x32xf32> -> vector<1x32xf32>
    %96 = arith.addf %92, %95 : vector<1x32xf32>
    %97 = vector.extract_strided_slice %0 {offsets = [6, 0], sizes = [1, 32], strides = [1, 1]} : vector<11x32xf32> to vector<1x32xf32>
    %98 = arith.addf %96, %97 : vector<1x32xf32>
    %cst_35 = arith.constant 0.000000e+00 : f32
    %99 = vector.broadcast %cst_35 : f32 to vector<1x32xf32>
    %100 = arith.maximumf %98, %99 : vector<1x32xf32>
    %101 = vector.extract_strided_slice %0 {offsets = [7, 0], sizes = [1, 32], strides = [1, 1]} : vector<11x32xf32> to vector<1x32xf32>
    %102 = arith.mulf %100, %101 : vector<1x32xf32>
    %cst_36 = arith.constant dense<0.000000e+00> : vector<1xf32>
    %103 = vector.multi_reduction <add>, %102, %cst_36 [1] : vector<1x32xf32> to vector<1xf32>
    %104 = vector.shape_cast %103 : vector<1xf32> to vector<1x1xf32>
    %105 = vector.extract_strided_slice %0 {offsets = [8, 0], sizes = [1, 32], strides = [1, 1]} : vector<11x32xf32> to vector<1x32xf32>
    %106 = vector.extract_strided_slice %105 {offsets = [0, 0], sizes = [1, 1], strides = [1, 1]} : vector<1x32xf32> to vector<1x1xf32>
    %107 = arith.addf %104, %106 : vector<1x1xf32>
    %cst_37 = arith.constant 0.000000e+00 : f32
    %108 = vector.broadcast %cst_37 : f32 to vector<1x1xf32>
    %109 = arith.subf %108, %107 : vector<1x1xf32>
    %110 = math.exp %109 : vector<1x1xf32>
    %cst_38 = arith.constant 1.000000e+00 : f32
    %111 = vector.broadcast %cst_38 : f32 to vector<1x1xf32>
    %112 = arith.addf %111, %110 : vector<1x1xf32>
    %113 = tpu.reciprocal %112 {approx = true} : vector<1x1xf32> -> vector<1x1xf32>
    %114 = vector.broadcast %113 : vector<1x1xf32> to vector<1x32xf32>
    %115 = arith.mulf %114, %74 : vector<1x32xf32>
    %cst_39 = arith.constant 1.000000e+00 : f32
    %116 = vector.broadcast %cst_39 : f32 to vector<1x1xf32>
    %117 = arith.subf %116, %113 : vector<1x1xf32>
    %118 = vector.broadcast %117 : vector<1x1xf32> to vector<1x32xf32>
    %119 = arith.mulf %118, %87 : vector<1x32xf32>
    %120 = arith.addf %115, %119 : vector<1x32xf32>
    %c0_40 = arith.constant 0 : index
    %c0_41 = arith.constant 0 : index
    %121 = vector.load %arg6[%c0_40, %c0_41] : memref<32x32xbf16, #tpu.memory_space<vmem>>, vector<32x32xbf16>
    %122 = arith.truncf %70 : vector<8x32xf32> to vector<8x32xbf16>
    %cst_42 = arith.constant dense<0.000000e+00> : vector<8x32xf32>
    %123 = tpu.matmul %122, %121, %cst_42 {dimension_numbers = #tpu.dot_dimension_numbers<[1], [0], [0], [1], [0, 0, 1, 1], [], []>} : vector<8x32xbf16>, vector<32x32xbf16>, vector<8x32xf32> -> vector<8x32xf32>
    %124 = vector.extract_strided_slice %0 {offsets = [9, 0], sizes = [1, 32], strides = [1, 1]} : vector<11x32xf32> to vector<1x32xf32>
    %125 = vector.broadcast %124 : vector<1x32xf32> to vector<8x32xf32>
    %126 = arith.addf %123, %125 : vector<8x32xf32>
    %cst_43 = arith.constant 0.000000e+00 : f32
    %127 = vector.broadcast %cst_43 : f32 to vector<8x32xf32>
    %128 = arith.maximumf %126, %127 : vector<8x32xf32>
    %c0_44 = arith.constant 0 : index
    %c0_45 = arith.constant 0 : index
    %129 = vector.load %arg7[%c0_44, %c0_45] : memref<32x32xbf16, #tpu.memory_space<vmem>>, vector<32x32xbf16>
    %130 = arith.truncf %128 : vector<8x32xf32> to vector<8x32xbf16>
    %cst_46 = arith.constant dense<0.000000e+00> : vector<8x32xf32>
    %131 = tpu.matmul %130, %129, %cst_46 {dimension_numbers = #tpu.dot_dimension_numbers<[1], [0], [0], [1], [0, 0, 1, 1], [], []>} : vector<8x32xbf16>, vector<32x32xbf16>, vector<8x32xf32> -> vector<8x32xf32>
    %132 = vector.extract_strided_slice %0 {offsets = [10, 0], sizes = [1, 32], strides = [1, 1]} : vector<11x32xf32> to vector<1x32xf32>
    %133 = vector.broadcast %132 : vector<1x32xf32> to vector<8x32xf32>
    %134 = arith.addf %131, %133 : vector<8x32xf32>
    %135 = arith.addf %70, %134 : vector<8x32xf32>
    %cst_47 = arith.constant dense<0.000000e+00> : vector<32xf32>
    %136 = vector.multi_reduction <add>, %135, %cst_47 [0] : vector<8x32xf32> to vector<32xf32>
    %137 = vector.shape_cast %136 : vector<32xf32> to vector<1x32xf32>
    %cst_48 = arith.constant 1.250000e-01 : f32
    %138 = vector.broadcast %cst_48 : f32 to vector<1x32xf32>
    %139 = arith.mulf %137, %138 : vector<1x32xf32>
    %140 = arith.mulf %139, %139 : vector<1x32xf32>
    %cst_49 = arith.constant dense<0.000000e+00> : vector<1xf32>
    %141 = vector.multi_reduction <add>, %140, %cst_49 [1] : vector<1x32xf32> to vector<1xf32>
    %142 = vector.shape_cast %141 : vector<1xf32> to vector<1x1xf32>
    %cst_50 = arith.constant 1.000000e-24 : f32
    %143 = vector.broadcast %cst_50 : f32 to vector<1x1xf32>
    %144 = arith.maximumf %142, %143 : vector<1x1xf32>
    %145 = math.rsqrt %144 : vector<1x1xf32>
    %146 = vector.broadcast %145 : vector<1x1xf32> to vector<1x32xf32>
    %147 = arith.mulf %139, %146 : vector<1x32xf32>
    %c0_51 = arith.constant 0 : index
    %c0_52 = arith.constant 0 : index
    %c0_53 = arith.constant 0 : index
    %148 = vector.load %arg11[%c0_51, %c0_52, %c0_53] : memref<1x3x32xf32, #tpu.memory_space<vmem>>, vector<1x1x32xf32>
    %149 = vector.shape_cast %148 : vector<1x1x32xf32> to vector<1x32xf32>
    %150 = vector.shape_cast %147 : vector<1x32xf32> to vector<1x1x32xf32>
    tpu.vector_store %arg11[%c0_51, %c0_52, %c0_53], %150 {strides = array<i32>} : memref<1x3x32xf32, #tpu.memory_space<vmem>>, vector<1x1x32xf32>,
    %151 = arith.mulf %87, %87 : vector<1x32xf32>
    %cst_54 = arith.constant dense<0.000000e+00> : vector<1xf32>
    %152 = vector.multi_reduction <add>, %151, %cst_54 [1] : vector<1x32xf32> to vector<1xf32>
    %153 = vector.shape_cast %152 : vector<1xf32> to vector<1x1xf32>
    %cst_55 = arith.constant 1.000000e-24 : f32
    %154 = vector.broadcast %cst_55 : f32 to vector<1x1xf32>
    %155 = arith.maximumf %153, %154 : vector<1x1xf32>
    %156 = math.rsqrt %155 : vector<1x1xf32>
    %157 = vector.broadcast %156 : vector<1x1xf32> to vector<1x32xf32>
    %158 = arith.mulf %87, %157 : vector<1x32xf32>
    %c0_56 = arith.constant 0 : index
    %c1 = arith.constant 1 : index
    %c0_57 = arith.constant 0 : index
    %159 = vector.load %arg11[%c0_56, %c1, %c0_57] : memref<1x3x32xf32, #tpu.memory_space<vmem>>, vector<1x1x32xf32>
    %160 = vector.shape_cast %159 : vector<1x1x32xf32> to vector<1x32xf32>
    %161 = vector.shape_cast %158 : vector<1x32xf32> to vector<1x1x32xf32>
    tpu.vector_store %arg11[%c0_56, %c1, %c0_57], %161 {strides = array<i32>} : memref<1x3x32xf32, #tpu.memory_space<vmem>>, vector<1x1x32xf32>,
    %162 = arith.mulf %120, %120 : vector<1x32xf32>
    %cst_58 = arith.constant dense<0.000000e+00> : vector<1xf32>
    %163 = vector.multi_reduction <add>, %162, %cst_58 [1] : vector<1x32xf32> to vector<1xf32>
    %164 = vector.shape_cast %163 : vector<1xf32> to vector<1x1xf32>
    %cst_59 = arith.constant 1.000000e-24 : f32
    %165 = vector.broadcast %cst_59 : f32 to vector<1x1xf32>
    %166 = arith.maximumf %164, %165 : vector<1x1xf32>
    %167 = math.rsqrt %166 : vector<1x1xf32>
    %168 = vector.broadcast %167 : vector<1x1xf32> to vector<1x32xf32>
    %169 = arith.mulf %120, %168 : vector<1x32xf32>
    %c0_60 = arith.constant 0 : index
    %c2 = arith.constant 2 : index
    %c0_61 = arith.constant 0 : index
    %170 = vector.load %arg11[%c0_60, %c2, %c0_61] : memref<1x3x32xf32, #tpu.memory_space<vmem>>, vector<1x1x32xf32>
    %171 = vector.shape_cast %170 : vector<1x1x32xf32> to vector<1x32xf32>
    %172 = vector.shape_cast %169 : vector<1x32xf32> to vector<1x1x32xf32>
    tpu.vector_store %arg11[%c0_60, %c2, %c0_61], %172 {strides = array<i32>} : memref<1x3x32xf32, #tpu.memory_space<vmem>>, vector<1x1x32xf32>,
    %173 = arith.mulf %14, %14 : vector<8x32xf32>
    %cst_62 = arith.constant dense<0.000000e+00> : vector<8xf32>
    %174 = vector.multi_reduction <add>, %173, %cst_62 [1] : vector<8x32xf32> to vector<8xf32>
    %175 = vector.shape_cast %174 : vector<8xf32> to vector<8x1xf32>
    %cst_63 = arith.constant 1.000000e-24 : f32
    %176 = vector.broadcast %cst_63 : f32 to vector<8x1xf32>
    %177 = arith.maximumf %175, %176 : vector<8x1xf32>
    %178 = math.rsqrt %177 : vector<8x1xf32>
    %179 = vector.broadcast %178 : vector<8x1xf32> to vector<8x32xf32>
    %180 = arith.mulf %14, %179 : vector<8x32xf32>
    %c0_64 = arith.constant 0 : index
    %c0_65 = arith.constant 0 : index
    %c0_66 = arith.constant 0 : index
    %c0_67 = arith.constant 0 : index
    %181 = vector.load %arg12[%c0_64, %c0_65, %c0_66, %c0_67] : memref<1x4x8x32xf32, #tpu.memory_space<vmem>>, vector<1x1x8x32xf32>
    %182 = vector.shape_cast %181 : vector<1x1x8x32xf32> to vector<8x32xf32>
    %183 = vector.shape_cast %180 : vector<8x32xf32> to vector<1x1x8x32xf32>
    tpu.vector_store %arg12[%c0_64, %c0_65, %c0_66, %c0_67], %183 {strides = array<i32>} : memref<1x4x8x32xf32, #tpu.memory_space<vmem>>, vector<1x1x8x32xf32>,
    %184 = arith.mulf %89, %89 : vector<8x32xf32>
    %cst_68 = arith.constant dense<0.000000e+00> : vector<8xf32>
    %185 = vector.multi_reduction <add>, %184, %cst_68 [1] : vector<8x32xf32> to vector<8xf32>
    %186 = vector.shape_cast %185 : vector<8xf32> to vector<8x1xf32>
    %cst_69 = arith.constant 1.000000e-24 : f32
    %187 = vector.broadcast %cst_69 : f32 to vector<8x1xf32>
    %188 = arith.maximumf %186, %187 : vector<8x1xf32>
    %189 = math.rsqrt %188 : vector<8x1xf32>
    %190 = vector.broadcast %189 : vector<8x1xf32> to vector<8x32xf32>
    %191 = arith.mulf %89, %190 : vector<8x32xf32>
    %c0_70 = arith.constant 0 : index
    %c1_71 = arith.constant 1 : index
    %c0_72 = arith.constant 0 : index
    %c0_73 = arith.constant 0 : index
    %192 = vector.load %arg12[%c0_70, %c1_71, %c0_72, %c0_73] : memref<1x4x8x32xf32, #tpu.memory_space<vmem>>, vector<1x1x8x32xf32>
    %193 = vector.shape_cast %192 : vector<1x1x8x32xf32> to vector<8x32xf32>
    %194 = vector.shape_cast %191 : vector<8x32xf32> to vector<1x1x8x32xf32>
    tpu.vector_store %arg12[%c0_70, %c1_71, %c0_72, %c0_73], %194 {strides = array<i32>} : memref<1x4x8x32xf32, #tpu.memory_space<vmem>>, vector<1x1x8x32xf32>,
    %c0_74 = arith.constant 0 : index
    %c2_75 = arith.constant 2 : index
    %c0_76 = arith.constant 0 : index
    %c0_77 = arith.constant 0 : index
    %195 = vector.load %arg12[%c0_74, %c2_75, %c0_76, %c0_77] : memref<1x4x8x32xf32, #tpu.memory_space<vmem>>, vector<1x1x8x32xf32>
    %196 = vector.shape_cast %195 : vector<1x1x8x32xf32> to vector<8x32xf32>
    %197 = vector.shape_cast %14 : vector<8x32xf32> to vector<1x1x8x32xf32>
    tpu.vector_store %arg12[%c0_74, %c2_75, %c0_76, %c0_77], %197 {strides = array<i32>} : memref<1x4x8x32xf32, #tpu.memory_space<vmem>>, vector<1x1x8x32xf32>,
    %c0_78 = arith.constant 0 : index
    %c3 = arith.constant 3 : index
    %c0_79 = arith.constant 0 : index
    %c0_80 = arith.constant 0 : index
    %198 = vector.load %arg12[%c0_78, %c3, %c0_79, %c0_80] : memref<1x4x8x32xf32, #tpu.memory_space<vmem>>, vector<1x1x8x32xf32>
    %199 = vector.shape_cast %198 : vector<1x1x8x32xf32> to vector<8x32xf32>
    %200 = vector.shape_cast %70 : vector<8x32xf32> to vector<1x1x8x32xf32>
    tpu.vector_store %arg12[%c0_78, %c3, %c0_79, %c0_80], %200 {strides = array<i32>} : memref<1x4x8x32xf32, #tpu.memory_space<vmem>>, vector<1x1x8x32xf32>,
    return
  }
  func.func @transform_0(%arg0: i32) -> (i32, i32, i32) {
    %c0_i32 = arith.constant 0 : i32
    %c0_i32_0 = arith.constant 0 : i32
    %c0_i32_1 = arith.constant 0 : i32
    return %arg0, %c0_i32, %c0_i32_0 : i32, i32, i32
  }
  func.func @transform_1(%arg0: i32) -> (i32, i32) {
    %c0_i32 = arith.constant 0 : i32
    %c0_i32_0 = arith.constant 0 : i32
    %c0_i32_1 = arith.constant 0 : i32
    return %c0_i32, %c0_i32_0 : i32, i32
  }
  func.func @transform_2(%arg0: i32) -> (i32, i32) {
    %c0_i32 = arith.constant 0 : i32
    %c0_i32_0 = arith.constant 0 : i32
    %c0_i32_1 = arith.constant 0 : i32
    return %c0_i32, %c0_i32_0 : i32, i32
  }
  func.func @transform_3(%arg0: i32) -> (i32, i32) {
    %c0_i32 = arith.constant 0 : i32
    %c0_i32_0 = arith.constant 0 : i32
    %c0_i32_1 = arith.constant 0 : i32
    return %c0_i32, %c0_i32_0 : i32, i32
  }
  func.func @transform_4(%arg0: i32) -> (i32, i32) {
    %c0_i32 = arith.constant 0 : i32
    %c0_i32_0 = arith.constant 0 : i32
    %c0_i32_1 = arith.constant 0 : i32
    return %c0_i32, %c0_i32_0 : i32, i32
  }
  func.func @transform_5(%arg0: i32) -> (i32, i32) {
    %c0_i32 = arith.constant 0 : i32
    %c0_i32_0 = arith.constant 0 : i32
    %c0_i32_1 = arith.constant 0 : i32
    return %c0_i32, %c0_i32_0 : i32, i32
  }
  func.func @transform_6(%arg0: i32) -> (i32, i32) {
    %c0_i32 = arith.constant 0 : i32
    %c0_i32_0 = arith.constant 0 : i32
    %c0_i32_1 = arith.constant 0 : i32
    return %c0_i32, %c0_i32_0 : i32, i32
  }
  func.func @transform_7(%arg0: i32) -> (i32, i32) {
    %c0_i32 = arith.constant 0 : i32
    %c0_i32_0 = arith.constant 0 : i32
    %c0_i32_1 = arith.constant 0 : i32
    return %c0_i32, %c0_i32_0 : i32, i32
  }
  func.func @transform_8(%arg0: i32) -> (i32, i32) {
    %c0_i32 = arith.constant 0 : i32
    %c0_i32_0 = arith.constant 0 : i32
    %c0_i32_1 = arith.constant 0 : i32
    return %c0_i32, %c0_i32_0 : i32, i32
  }
  func.func @transform_9(%arg0: i32) -> (i32, i32) {
    %c0_i32 = arith.constant 0 : i32
    %c0_i32_0 = arith.constant 0 : i32
    %c0_i32_1 = arith.constant 0 : i32
    return %c0_i32, %c0_i32_0 : i32, i32
  }
  func.func @transform_10(%arg0: i32) -> (i32, i32, i32) {
    %c0_i32 = arith.constant 0 : i32
    %c0_i32_0 = arith.constant 0 : i32
    %c0_i32_1 = arith.constant 0 : i32
    return %arg0, %c0_i32, %c0_i32_0 : i32, i32, i32
  }
  func.func @transform_11(%arg0: i32) -> (i32, i32, i32, i32) {
    %c0_i32 = arith.constant 0 : i32
    %c0_i32_0 = arith.constant 0 : i32
    %c0_i32_1 = arith.constant 0 : i32
    %c0_i32_2 = arith.constant 0 : i32
    return %arg0, %c0_i32, %c0_i32_0, %c0_i32_1 : i32, i32, i32, i32
  }
}

</mosaic_0001>

<bundles_post_ra>
// kernel: tpu_custom_call.1
= control target key start
LH: loop header
LB: loop body
LE: loop exit
PB: predicated region body
PF: predicated region fallthrough
CT: control target
= control target key end

     0   :  { %s2663_s0 = inlined_call_operand.hbm [shape: f32[2,8,32], index: 0, kind: input, shape index: {}]   ;;  %s2664_s1 = inlined_call_operand.hbm [shape: bf16[32,32], index: 1, kind: input, shape index: {}]   ;;  %s2665_s2 = inlined_call_operand.hbm [shape: bf16[32,64], index: 2, kind: input, shape index: {}]   ;;  %s2666_s3 = inlined_call_operand.vmem [shape: f32[1,64], index: 3, kind: input, shape index: {}]   ;;  %s2667_s4 = inlined_call_operand.hbm [shape: bf16[32,32], index: 4, kind: input, shape index: {}]   ;;  %s2668_s5 = inlined_call_operand.vmem [shape: bf16[32,32], index: 5, kind: input, shape index: {}]   ;;  %s2669_s6 = inlined_call_operand.hbm [shape: bf16[32,32], index: 6, kind: input, shape index: {}]   ;;  %s2670_s7 = inlined_call_operand.hbm [shape: bf16[32,32], index: 7, kind: input, shape index: {}]   ;;  %s2671_s8 = inlined_call_operand.hbm [shape: bf16[32,32], index: 8, kind: input, shape index: {}]   ;;  %s2672_s9 = inlined_call_operand.vmem [shape: f32[11,32], index: 9, kind: input, shape index: {}]   ;;  %s2673_s10 = inlined_call_operand.vmem [shape: f32[2,3,32], index: 10, kind: output, shape index: {0}]   ;;  %s2674_s11 = inlined_call_operand.hbm [shape: f32[2,4,8,32], index: 11, kind: output, shape index: {1}]  }
   0x1   :  { %2680 = sst [smem:[#allocation20_spill]] %s2664_s1 }
   0x2   :  { %2681 = sst [smem:[#allocation21_spill]] %s2668_s5 }
   0x3   :  { %2682 = sst [smem:[#allocation22_spill]] %s2673_s10 }
   0x4   :  { %2683 = sst [smem:[#allocation23_spill]] %s2674_s11 }
   0x5   :  { %17 = vsyncpa [#allocation3], 0 }
   0x6   :  { %19 = vsyncpa [#allocation3 + $0x1], 0 }
   0x7   :  { %20 = vsyncpa [#allocation6], 0 }
   0x8   :  { %21 = vsyncpa [#allocation9], 0 }
   0x9   :  { %22 = vsyncpa [#allocation12], 0 }
   0xa   :  { %23 = vsyncpa [#allocation4], 0 }
   0xb   :  { %25 = vsyncpa [#allocation4 + $0x1], 0  ;;  %s2152_s17 = smov 0   ;;  %s2154_s18 = smov 0  }
   0xc   :  { %s2156_s19 = smov 0   ;;  %s2158_s20 = smov 0  }
   0xd LB: > { %s2073_s21 = smov [#allocation5]   ;;  %s2173_s23 = sadd.s32 4294967295, %s2071_s20   ;;  %s2071_s20 = sphi %s2158_s20, %s2710_s20   ;;  %s2067_s19 = sphi %s2156_s19, %s2709_s19   ;;  %s2063_s18 = sphi %s2154_s18, %s2708_s18   ;;  %s2059_s17 = sphi %s2152_s17, %s2707_s17  }
   0xe   : > { %s315_s22 = sshll.u32 %s2073_s21, 4  ;;  %p1474_p0 = scmp.ge.s32.totalorder %s2071_s20, 1  ;;  %s2178_s22 = int_to_ptr.vmem [resolvable:$true] %s315_s22 }
   0xf   : > { %p2677_p1 = scmp.eq.s32.totalorder %s2173_s23, 0  ;;  %p303_p2 = scmp.lt.s32.totalorder %s2071_s20, 3 }
  0x10   : > { %s2074_s25 = smov [#allocation8]   ;;  %s2075_s28 = smov [#allocation11]  }
  0x11   : > { %p2180_p3 = pnand %p1474_p0, %p303_p2  ;;  %s344_s26 = sshll.u32 %s2074_s25, 4  ;;  %s2193_s26 = int_to_ptr.vmem [resolvable:$true] %s344_s26 }
  0x12   : > { %s373_s29 = sshll.u32 %s2075_s28, 4  ;;  %s2686_s1 = sld [smem:[#allocation20_spill]]  ;;  %s2195_s29 = int_to_ptr.vmem [resolvable:$true] %s373_s29 }
  0x13   : > { %s2684_s24 = scalar_select %p2180_p3, 1, 0 }
  0x14   : > { %p1666_p5 = pneg %p2180_p3 }
  0x16   : > { %p2189_p6 = pnand %p1666_p5, %p2677_p1 }
  0x18   : > { %s1795_s13 = scalar_lea.hbm %s2686_s1, 256  ;;  %p2205_p8 = pneg %p2189_p6 }
  0x19   : > { %p1796_p7 = scmp.ne.s32.totalorder %s2686_s1, %s1795_s13  ;;  %p1802_p11 = scmp.lt.u32.totalorder %s1795_s13, %s2686_s1 }
  0x1b   : > { %p1798_p9 = pnand %p2205_p8, %p1796_p7 }
  0x1d   : > { %p1799_p10 = pneg %p1798_p9 }
  0x1f   : > { %p1804_p12 = pnand %p1802_p11, %p1799_p10 }
  0x21   : > { %1807 = shalt.err (!%p1804_p12)
}
  0x22   : > { %s1808_s28 = scalar_lea.vmem %s2178_s22, 256  ;;  %p1816_p5 = scmp.lt.s32.totalorder %s2178_s22, %s2178_s22 }
  0x23   : > { %p1809_p13 = scmp.ne.s32.totalorder %s2178_s22, %s1808_s28  ;;  %p1817_p4 = scmp.lt.s32.totalorder %s1808_s28, %s1808_s28 }
  0x25   : > { %p1811_p0 = pnand %p1809_p13, %p2205_p8  ;;  %p1818_p7 = por %p1817_p4, %p1816_p5 }
  0x27   : > { %p1812_p2 = pneg %p1811_p0 }
  0x29   : > { %p1819_p9 = pnand %p1818_p7, %p1812_p2 }
  0x2b   : > { %1822 = shalt.err (!%p1819_p9)
}
  0x2c   : > { %s2076_s30 = smov 64   ;;  %s2077_s12 = smov 4  }
  0x2d   : > { %1669 = dma.hbm_to_vmem [thread:$0]  (!%p2189_p6), %s2686_s1, 256, %s2178_s22, [#allocation6], %s2076_s30, %s2076_s30, %s2077_s12  }
  0x2e   : > { %s1823_s25 = scalar_lea.hbm %s2667_s4, 256 }
  0x2f   : > { %p1824_p4 = scmp.ne.s32.totalorder %s2667_s4, %s1823_s25  ;;  %p1830_p12 = scmp.lt.u32.totalorder %s1823_s25, %s2667_s4 }
  0x31   : > { %p1826_p10 = pnand %p1824_p4, %p2205_p8 }
  0x33   : > { %p1827_p11 = pneg %p1826_p10 }
  0x35   : > { %p1832_p13 = pnand %p1830_p12, %p1827_p11 }
  0x37   : > { %1835 = shalt.err (!%p1832_p13)
}
  0x38   : > { %s1836_s22 = scalar_lea.vmem %s2193_s26, 256  ;;  %p1844_p7 = scmp.lt.s32.totalorder %s2193_s26, %s2193_s26 }
  0x39   : > { %p1837_p0 = scmp.ne.s32.totalorder %s2193_s26, %s1836_s22  ;;  %p1845_p9 = scmp.lt.s32.totalorder %s1836_s22, %s1836_s22 }
  0x3b   : > { %p1839_p2 = pnand %p1837_p0, %p2205_p8  ;;  %p1846_p4 = por %p1845_p9, %p1844_p7 }
  0x3d   : > { %p1840_p5 = pneg %p1839_p2 }
  0x3f   : > { %p1847_p10 = pnand %p1846_p4, %p1840_p5 }
  0x41   : > { %1850 = shalt.err (!%p1847_p10)
}
  0x42   : > { %1675 = dma.hbm_to_vmem [thread:$0]  (!%p2189_p6), %s2667_s4, 256, %s2193_s26, [#allocation9], %s2076_s30, %s2076_s30, %s2077_s12  }
  0x43   : > { %s1851_s14 = scalar_lea.hbm %s2670_s7, 256 }
  0x44   : > { %p1852_p11 = scmp.ne.s32.totalorder %s2670_s7, %s1851_s14  ;;  %p1858_p0 = scmp.lt.u32.totalorder %s1851_s14, %s2670_s7 }
  0x46   : > { %p1854_p12 = pnand %p1852_p11, %p2205_p8 }
  0x48   : > { %p1855_p13 = pneg %p1854_p12 }
  0x4a   : > { %p1860_p2 = pnand %p1858_p0, %p1855_p13 }
  0x4c   : > { %1863 = shalt.err (!%p1860_p2)
}
  0x4d   : > { %s1864_s26 = scalar_lea.vmem %s2195_s29, 256  ;;  %p1872_p4 = scmp.lt.s32.totalorder %s2195_s29, %s2195_s29 }
  0x4e   : > { %p1865_p5 = scmp.ne.s32.totalorder %s2195_s29, %s1864_s26  ;;  %p1873_p10 = scmp.lt.s32.totalorder %s1864_s26, %s1864_s26 }
  0x50   : > { %p1867_p7 = pnand %p1865_p5, %p2205_p8  ;;  %p1874_p11 = por %p1873_p10, %p1872_p4 }
  0x52   : > { %p1868_p9 = pneg %p1867_p7 }
  0x54   : > { %p1875_p12 = pnand %p1874_p11, %p1868_p9 }
  0x56   : > { %1878 = shalt.err (!%p1875_p12)
}
  0x57   : > { %1681 = dma.hbm_to_vmem [thread:$0]  (!%p2189_p6), %s2670_s7, 256, %s2195_s29, [#allocation12], %s2076_s30, %s2076_s30, %s2077_s12  }
  0x58   : > { %s2078_s10 = smov [#allocation7]   ;;  %s2079_s13 = smov [#allocation10]  }
  0x59   : > { %s328_s11 = sshll.u32 %s2078_s10, 4  ;;  %s360_s14 = sshll.u32 %s2079_s13, 4  ;;  %s329_s11 = int_to_ptr.vmem [resolvable:$true] %s328_s11  ;;  %s361_s14 = int_to_ptr.vmem [resolvable:$true] %s360_s14 }
  0x5a   : > { %s1879_s25 = scalar_lea.hbm %s2665_s2, 256 }
  0x5b   : > { %p1880_p13 = scmp.ne.s32.totalorder %s2665_s2, %s1879_s25  ;;  %p1886_p5 = scmp.lt.u32.totalorder %s1879_s25, %s2665_s2 }
  0x5d   : > { %p1882_p0 = pnand %p1880_p13, %p2205_p8 }
  0x5f   : > { %p1883_p2 = pneg %p1882_p0 }
  0x61   : > { %p1888_p7 = pnand %p1886_p5, %p1883_p2 }
  0x63   : > { %1891 = shalt.err (!%p1888_p7)
}
  0x64   : > { %s1892_s29 = scalar_lea.vmem %s329_s11, 256  ;;  %p1900_p11 = scmp.lt.s32.totalorder %s329_s11, %s329_s11 }
  0x65   : > { %p1893_p9 = scmp.ne.s32.totalorder %s329_s11, %s1892_s29  ;;  %p1901_p12 = scmp.lt.s32.totalorder %s1892_s29, %s1892_s29 }
  0x67   : > { %p1895_p4 = pnand %p1893_p9, %p2205_p8  ;;  %p1902_p1 = por %p1901_p12, %p1900_p11 }
  0x69   : > { %p1896_p10 = pneg %p1895_p4 }
  0x6b   : > { %p1903_p3 = pnand %p1902_p1, %p1896_p10 }
  0x6d   : > { %1906 = shalt.err (!%p1903_p3)
}
  0x6e   : > { %1672 = dma.hbm_to_vmem [thread:$0]  (!%p2189_p6), %s2665_s2, 256, %s329_s11, [#allocation6], %s2076_s30, %s2076_s30, %s2077_s12  }
  0x6f   : > { %s1907_s15 = scalar_lea.hbm %s2669_s6, 256 }
  0x70   : > { %p1908_p1 = scmp.ne.s32.totalorder %s2669_s6, %s1907_s15  ;;  %p1914_p0 = scmp.lt.u32.totalorder %s1907_s15, %s2669_s6 }
  0x72   : > { %p1910_p3 = pnand %p1908_p1, %p2205_p8 }
  0x74   : > { %p1911_p13 = pneg %p1910_p3 }
  0x76   : > { %p1916_p2 = pnand %p1914_p0, %p1911_p13 }
  0x78   : > { %1919 = shalt.err (!%p1916_p2)
}
  0x79   : > { %s1920_s22 = scalar_lea.vmem %s361_s14, 256  ;;  %p1928_p4 = scmp.lt.s32.totalorder %s361_s14, %s361_s14 }
  0x7a   : > { %p1921_p5 = scmp.ne.s32.totalorder %s361_s14, %s1920_s22  ;;  %p1929_p10 = scmp.lt.s32.totalorder %s1920_s22, %s1920_s22 }
  0x7c   : > { %p1923_p7 = pnand %p1921_p5, %p2205_p8  ;;  %p1930_p11 = por %p1929_p10, %p1928_p4 }
  0x7e   : > { %p1924_p9 = pneg %p1923_p7 }
  0x80   : > { %p1931_p12 = pnand %p1930_p11, %p1924_p9 }
  0x82   : > { %1934 = shalt.err (!%p1931_p12)
}
  0x83   : > { %1678 = dma.hbm_to_vmem [thread:$0]  (!%p2189_p6), %s2669_s6, 256, %s361_s14, [#allocation9], %s2076_s30, %s2076_s30, %s2077_s12  }
  0x84   : > { %s2080_s1 = smov [#allocation13]   ;;  %s1935_s15 = scalar_lea.hbm %s2671_s8, 256 }
  0x85   : > { %s386_s5 = sshll.u32 %s2080_s1, 4  ;;  %p1936_p1 = scmp.ne.s32.totalorder %s2671_s8, %s1935_s15  ;;  %s387_s5 = int_to_ptr.vmem [resolvable:$true] %s386_s5 }
  0x86   : > { %p1942_p0 = scmp.lt.u32.totalorder %s1935_s15, %s2671_s8 }
  0x87   : > { %p1938_p3 = pnand %p1936_p1, %p2205_p8 }
  0x89   : > { %p1939_p13 = pneg %p1938_p3 }
  0x8b   : > { %p1944_p2 = pnand %p1942_p0, %p1939_p13 }
  0x8d   : > { %1947 = shalt.err (!%p1944_p2)
}
  0x8e   : > { %s1948_s14 = scalar_lea.vmem %s387_s5, 256  ;;  %p1956_p4 = scmp.lt.s32.totalorder %s387_s5, %s387_s5 }
  0x8f   : > { %p1949_p5 = scmp.ne.s32.totalorder %s387_s5, %s1948_s14  ;;  %p1957_p10 = scmp.lt.s32.totalorder %s1948_s14, %s1948_s14 }
  0x91   : > { %p1951_p7 = pnand %p1949_p5, %p2205_p8  ;;  %p1958_p11 = por %p1957_p10, %p1956_p4 }
  0x93   : > { %p1952_p9 = pneg %p1951_p7 }
  0x95   : > { %p1959_p12 = pnand %p1958_p11, %p1952_p9 }
  0x97   : > { %1962 = shalt.err (!%p1959_p12)
}
  0x98   : > { %1684 = dma.hbm_to_vmem [thread:$0]  (!%p2189_p6), %s2671_s8, 256, %s387_s5, [#allocation12], %s2076_s30, %s2076_s30, %s2077_s12  }
  0x99   : > { %s1473_s27 = sadd.s32 4294967294, %s2071_s20   ;;  %s2346_s16 = sadd.s32 1, %s2071_s20  }
  0x9a   : > { %s35_s29 = ssub.s32 %s2071_s20, %s2346_s16  ;;  %s38_s1 = sadd.s32 1, %s2067_s19 }
  0x9b   : > { %p36_p8 = scmp.eq.s32.totalorder %s35_s29, 0  ;;  %p45_p1 = scmp.ne.s32.totalorder %s2067_s19, %s2063_s18 }
  0x9c   : > { %p46_p3 = scmp.eq.s32.totalorder %s2071_s20, 0  ;;  %p51_p13 = scmp.ne.s32.totalorder %s2063_s18, %s2059_s17 }
  0x9d   : > { %s2357_s10 = scalar_select %p36_p8, %s2067_s19, %s38_s1  }
  0x9e   : > { %p2359_p0 = por %p46_p3, %p45_p1  ;;  %p2689_p2 = scmp.eq.s32.totalorder %s2173_s23, 0 }
  0x9f   : > { %p290_p5 = scmp.eq.s32.totalorder %s2173_s23, 1  ;;  %p296_p7 = scmp.eq.s32.totalorder %s1473_s27, 1 }
  0xa0   : > { %p2365_p6 = por %p2689_p2, %p51_p13  ;;  %p1699_p9 = scmp.lt.s32.totalorder %s2071_s20, 2 }
  0xa1   : > { %s403_s12 = sand.u32 1, %s2067_s19   ;;  %p2372_p4 = por %p290_p5, %p45_p1 }
  0xa2   : > { %p2376_p10 = por %p296_p7, %p51_p13  ;;  %s1482_s21 = sshll.u32 %s403_s12, 3 }
  0xa3   : > { %s2691_s5 = scalar_select %p2372_p4, 1, 0 }
  0xa4   : > { %s2692_s15 = scalar_select %p2376_p10, 1, 0 }
  0xa5   : > { %s1483_s25 = sshll.u32 %s2071_s20, 7  ;;  %s407_s22 = scalar_lea.vmem [#allocation2], %s1482_s21 }
  0xa6   : > { %s2384_s14 = scalar_lea.hbm %s2663_s0, %s1483_s25  ;;  %s414_s11 = sshll.u32 %s407_s22, 4  ;;  %s2386_s11 = int_to_ptr.vmem [resolvable:$true] %s414_s11 }
  0xa7   : > { %p2390_p11 = pnand %p1699_p9, %p2359_p0  ;;  %s404_s29 = scalar_lea.sflag [#allocation3], %s403_s12 }
  0xa8   : > { %s1963_s1 = scalar_lea.hbm %s2384_s14, 128  ;;  %s1968_s28 = scalar_lea.hbm %s2663_s0, 256 }
  0xa9   : > { %p1964_p12 = scmp.ne.s32.totalorder %s2384_s14, %s1963_s1  ;;  %p1965_p8 = pneg %p2390_p11 }
  0xaa   : > { %p1969_p13 = scmp.lt.u32.totalorder %s2384_s14, %s2663_s0  ;;  %p1970_p0 = scmp.lt.u32.totalorder %s1968_s28, %s1963_s1 }
  0xab   : > { %p1966_p1 = pnand %p1965_p8, %p1964_p12  ;;  %p1972_p5 = scmp.lt.u32.totalorder %s1963_s1, %s2384_s14 }
  0xac   : > { %p1971_p2 = por %p1970_p0, %p1969_p13 }
  0xad   : > { %p1967_p3 = pneg %p1966_p1 }
  0xae   : > { %p1973_p7 = por %p1972_p5, %p1971_p2 }
  0xb0   : > { %p1974_p9 = pnand %p1973_p7, %p1967_p3 }
  0xb2   : > { %1977 = shalt.err (!%p1974_p9)
}
  0xb3   : > { %s1978_s12 = scalar_lea.vmem %s2386_s11, 128  ;;  %s2081_s22 = smov [#allocation2]  }
  0xb4   : > { %p1979_p12 = scmp.ne.s32.totalorder %s2386_s11, %s1978_s12  ;;  %s1983_s21 = sshll.u32 %s2081_s22, 4  ;;  %s1984_s21 = int_to_ptr.vmem [resolvable:$false] %s1983_s21 }
  0xb5   : > { %s1985_s25 = scalar_lea.vmem %s1984_s21, 256  ;;  %p1986_p4 = scmp.lt.s32.totalorder %s2386_s11, %s1984_s21 }
  0xb6   : > { %p1981_p1 = pnand %p1979_p12, %p1965_p8  ;;  %p1987_p13 = scmp.lt.s32.totalorder %s1985_s25, %s1978_s12 }
  0xb8   : > { %p1982_p10 = pneg %p1981_p1  ;;  %p1988_p0 = por %p1987_p13, %p1986_p4 }
  0xba   : > { %p1989_p2 = pnand %p1988_p0, %p1982_p10 }
  0xbc   : > { %1992 = shalt.err (!%p1989_p2)
}
  0xbd   : > { %1688 = dma.hbm_to_vmem [thread:$0]  (!%p2390_p11), %s2384_s14, 128, %s2386_s11, %s404_s29  }
  0xbe   : > { %p2694_p3 = scmp.ne.s32.totalorder %s2684_s24, 0 }
  0xbf   : > { %s2422_s1 = sand.u32 (!%p2694_p3), 1, %s2063_s18  }
  0xc0   : > { %423 = sbr.rel (%p2694_p3) target bundleno = 2599 (0xa27), region = 60  ;;  %s1485_s28 = sshll.u32 (!%p2694_p3), %s2422_s1, 3 }
  0xc1   : > { %s426_s13 = scalar_lea.sflag (!%p2694_p3), [#allocation3], %s2422_s1  ;;  %s429_s26 = scalar_lea.vmem (!%p2694_p3), [#allocation2], %s1485_s28 }
  0xc7   : > { %2038 = dma.done.wait (%p2365_p6), %s426_s13, 128  }
  0xc8   : > { %2040 = vsyncadd (%p2365_p6), %s426_s13, 4294967168  ;;  %p2695_p4 = scmp.eq.s32.totalorder %s2173_s23, 0 }
  0xca   : > { %2042 = dma.done.wait (%p2695_p4), [#allocation6], 512   ;;  %p2696_p10 = pmov %p2695_p4 }
  0xcb   : > { %p2697_p11 = pmov %p2695_p4 }
  0xcc   : > { %2044 = vsyncadd (%p2696_p10), [#allocation6], 4294966784 }
  0xcd   : > { %2046 = dma.done.wait (%p2697_p11), [#allocation9], 512   ;;  %p2698_p8 = pmov %p2695_p4 }
  0xce   : > { %p2699_p5 = pmov %p2695_p4 }
  0xcf   : > { %2048 = vsyncadd (%p2698_p8), [#allocation9], 4294966784 }
  0xd0   : > { %2050 = dma.done.wait (%p2699_p5), [#allocation12], 512   ;;  %p2700_p7 = pmov %p2695_p4 }
  0xd1   : > { %v2082_v0 = vmov 0.0   ;;  %vm2083_vm0 = vmmov 0   ;;  %v1757_v1 = vld [vmem:[#allocation5] sm:$0xff]   ;;  %v1758_v2 = vld [vmem:[#allocation5 + $0x8] sm:$0xff]   ;;  %v503_v3 = vld [vmem:[%s429_s26] sm:$0xff]  ;;  %vm525_vm1 = vcmask 261120   ;;  %v509_v7 = vlaneseq }
  0xd2   : > { %2052 = vsyncadd (%p2700_p7), [#allocation12], 4294966784  ;;  %1558 = vmatprep.subr.bf16.mxu0 %v2082_v0  ;;  %1562 = vmatprep.mubr.msk.bf16.mxu0 %vm2083_vm0, %v2082_v0  ;;  %v508_v4 = vpack.c.bf16 %v503_v3, %v503_v3  ;;  %v1759_v5 = vld [vmem:[#allocation7] sm:$0xff]   ;;  %v1760_v6 = vld [vmem:[#allocation7 + $0x8] sm:$0xff]   ;;  %s1492_s14 = sshll.u32 %s2422_s1, 5  ;;  %vm714_vm2 = vcmask 1043456  }
  0xd3   : > { %1566 = vmatprep.subr.bf16.mxu1 %v2082_v0  ;;  %1570 = vmatprep.mubr.msk.bf16.mxu1 %vm2083_vm0, %v2082_v0  ;;  %v2455_v8 = vshrl.u32 %v509_v7, 7  ;;  %v2461_v10 = vld [vmem:[%s2672_s9] sm:$0xff]  ;;  %s2468_s11 = scalar_lea.vmem [#allocation14], %s1492_s14  ;;  %s2084_s12 = smov 112   ;;  %vm650_vm3 = vcmask 130048   ;;  %vm698_vm4 = vcmask 64512  }
  0xd4   : > { %1559 = vmatpush3.bf16.msra.mxu0 %v1757_v1  ;;  %1567 = vmatpush3.bf16.msra.mxu1 %v1759_v5  ;;  %v1497_v29 = vld [vmem:[%s2666_s3] ss:$0 sm:$0xff]  ;;  %s2085_s22 = smov 96   ;;  %s2086_s21 = smov 80   ;;  %vm1091_vm5 = vcmask 253952  }
  0xd5   : > { %1560 = vmatprep.subr.bf16.mxu0 %v2082_v0  ;;  %1568 = vmatprep.subr.bf16.mxu1 %v2082_v0  ;;  %v511_v9 = vsub.s32 0, %v2455_v8  ;;  %s2087_s25 = smov 16   ;;  %s2701_s26 = sld [smem:[#allocation21_spill]] }
  0xd6   : > { %s1528_s29 = sshll.u32 %s2173_s23, 9  ;;  %s1303_s13 = scalar_lea.sflag [#allocation4], %s2422_s1 }
  0xd7   : > { %v512_v11 = vrot.slane %v2461_v10, %v511_v9  ;;  %p2703_p9 = scmp.ne.s32.totalorder %s2691_s5, 0  ;;  %s2089_s30 = smov [#allocation14]  }
  0xd8   : > { %1561 = vmatpush3.bf16.msra.mxu0 %v1758_v2  ;;  %1569 = vmatpush3.bf16.msra.mxu1 %v1760_v6  ;;  %s1997_s14 = sshll.u32 %s2089_s30, 4  ;;  %s1998_s14 = int_to_ptr.vmem [resolvable:$false] %s1997_s14 }
  0xd9   : > { %1574 = vmatprep.subr.bf16.mxu0 %v2082_v0  ;;  %1580 = vmatprep.subr.bf16.mxu1 %v2082_v0  ;;  %s1999_s27 = scalar_lea.vmem %s1998_s14, 1024 }
  0xdb   : > { %1563 = vmatmul.mubr.msk.bf16.vlgmr.msra.gmra.mrb[0].mxu0 %vm525_vm1, %v508_v4 }
  0xdc   : > { %1576 = vmatprep.mubr.msk.bf16.mxu0 %vm2083_vm0, %v2082_v0 }
 0x1ae   : > { %v563_v12 = vpop.f32.mrb[0].mxu0 }
 0x1af   : > { %v564_v13 = vadd.f32 %v563_v12, %v512_v11  ;;  %v1564_v14 = vpop.f32.mrb[1].mxu0 }
 0x1b0   : > { %v566_v15 = vpop.f32.mrb[2].mxu0 }
 0x1b1   : > { %v569_v16 = vmul.f32 %v564_v13, %v564_v13  ;;  %v1565_v17 = vpop.f32.mrb[3].mxu0 }
 0x1b2   : > { %v1762_v17 = vld [vmem:[#allocation8 + $0x8] sm:$0xff]  }
 0x1b3   : > { %v570_v18 = vsel %vm525_vm1, %v569_v16, 0.0  ;;  %v1761_v16 = vld [vmem:[#allocation8] sm:$0xff]  }
 0x1b4   : > { %v571_v19 = vrot.slane %v570_v18, 4 }
 0x1b6   : > { %v572_v20 = vadd.f32 %v571_v19, %v570_v18 }
 0x1b8   : > { %v573_v21 = vrot.slane %v572_v20, 2 }
 0x1ba   : > { %v574_v22 = vadd.f32 %v573_v21, %v572_v20 }
 0x1bc   : > { %v575_v23 = vrot.slane %v574_v22, 1 }
 0x1be   : > { %v576_v24 = vadd.f32 %v575_v23, %v574_v22  ;;  %v876_v22 = vsub.s32 1, %v2455_v8 }
 0x1c0   : > { %1771 = vrsqrt.f32 %v576_v24  ;;  %v877_v23 = vrot.slane %v2461_v10, %v876_v22  ;;  %v882_v24 = vsub.s32 2, %v2455_v8 }
 0x1ca   : > { %v1772_v25 = vpop.eup %1771 }
 0x1cb   : > { %v2466_v26 = vmul.f32 %v1772_v25, %v564_v13 }
 0x1cd   : > { %1521 = vst.msk [vmem:[%s2468_s11 + $0x10] sm:$0xff] %vm525_vm1, %v2466_v26  ;;  %v583_v27 = vpack.c.bf16 %v2466_v26, %v2466_v26 }
 0x1cf   : > { %1571 = vmatmul.mubr.msk.bf16.vlgmr.msra.gmra.mrb[0].mxu1 %vm525_vm1, %v583_v27  ;;  %v715_v28 = vsel %vm714_vm2, %v583_v27, 0 }
 0x1d0   : > { %1581 = vmatpush3.bf16.msra.mxu1 %v715_v28  ;;  %1582 = vmatprep.mubr.msk.bf16.mxu1 %vm2083_vm0, %v2082_v0  ;;  %v883_v28 = vrot.slane %v2461_v10, %v882_v24 }
 0x1d1   : > { %1592 = vmatprep.subr.bf16.mxu1 %v2082_v0 }
 0x2a2   : > { %v640_v30 = vpop.f32.mrb[0].mxu1 }
 0x2a3   : > { %v641_v31 = vadd.f32 %v1497_v29, %v640_v30  ;;  %v1572_v32 = vpop.f32.mrb[1].mxu1 }
 0x2a4   : > { %v643_v33 = vpop.f32.mrb[2].mxu1 }
 0x2a5   : > { %v646_v34 = vpack.c.bf16 %v641_v31, %v641_v31  ;;  %v1573_v35 = vpop.f32.mrb[3].mxu1 }
 0x2a7   : > { %757 = vrot.lane.b32.xlu1 %v646_v34, %s2084_s12  ;;  %648 = vrot.lane.b32.xlu0 %v646_v34, %s2085_s22 }
 0x2ab   : > { %759 = vrot.lane.b32.xlu0 %v646_v34, %s2086_s21 }
 0x319   : > { %v649_v36 = vpop.permute.xlu0 %648  ;;  %v758_v40 = vpop.permute.xlu1 %757 }
 0x31a   : > { %v655_v37 = vsel %vm650_vm3, %v649_v36, 0 }
 0x31b   : > { %1575 = vmatpush3.bf16.xpose.msra.mxu0 %v655_v37 }
 0x31c   : > { %1586 = vmatprep.subr.bf16.mxu0 %v2082_v0 }
 0x31d   : > { %v760_v38 = vpop.permute.xlu0 %759 }
 0x31e   : > { %v765_v39 = vsel %vm650_vm3, %v760_v38, 0 }
 0x322   : > { %1577 = vmatmul.mubr.msk.bf16.vlgmr.msra.gmra.mrb[4].mxu0 %vm650_vm3, %v646_v34 }
 0x323   : > { %1587 = vmatpush3.bf16.xpose.msra.mxu0 %v765_v39  ;;  %1588 = vmatprep.mubr.msk.bf16.mxu0 %vm2083_vm0, %v2082_v0 }
 0x324   : > { %1598 = vmatprep.subr.bf16.mxu0 %v2082_v0 }
 0x32a   : > { %1589 = vmatmul.mubr.msk.bf16.vlgmr.msra.gmra.mrb[8].mxu0 %vm650_vm3, %v758_v40  ;;  %v1763_v40 = vld [vmem:[#allocation11] sm:$0xff]  }
 0x32b   : > { %1602 = vmatprep.mubr.msk.bf16.mxu0 %vm2083_vm0, %v2082_v0  ;;  %1599 = vmatpush3.bf16.msra.mxu0 %v1761_v16 }
 0x32c   : > { %1600 = vmatprep.subr.bf16.mxu0 %v2082_v0 }
 0x32f   : > { %1601 = vmatpush3.bf16.msra.mxu0 %v1762_v17 }
 0x330   : > { %1614 = vmatprep.subr.bf16.mxu0 %v2082_v0 }
 0x3f5   : > { %v691_v41 = vpop.f32.mrb[4].mxu0 }
 0x3f6   : > { %v697_v42 = vmul.f32 0.25, %v691_v41  ;;  %v1578_v43 = vpop.f32.mrb[5].mxu0 }
 0x3f7   : > { %v694_v44 = vpop.f32.mrb[6].mxu0  ;;  %v1765_v43 = vld [vmem:[#allocation13] sm:$0xff]  }
 0x3f8   : > { %v1579_v45 = vpop.f32.mrb[7].mxu0  ;;  %v699_v46 = vsel %vm698_vm4, %v697_v42, -inf  ;;  %v1766_v44 = vld [vmem:[#allocation13 + $0x8] sm:$0xff]  }
 0x3f9   : > { %700 = vmax.xlane.f32.xlu1 %v699_v46  ;;  %v911_v45 = vrot.slane %v2461_v10, 3 }
 0x3fd   : > { %v801_v47 = vpop.f32.mrb[8].mxu0 }
 0x3fe   : > { %v807_v48 = vmul.f32 0.25, %v801_v47  ;;  %v1590_v49 = vpop.f32.mrb[9].mxu0 }
 0x3ff   : > { %v804_v50 = vpop.f32.mrb[10].mxu0 }
 0x400   : > { %v1591_v51 = vpop.f32.mrb[11].mxu0  ;;  %v808_v52 = vsel %vm698_vm4, %v807_v48, -inf }
 0x401   : > { %809 = vmax.xlane.f32.xlu0 %v808_v52  ;;  %v1767_v52 = vld [vmem:[%s2701_s26] sm:$0xff]  }
 0x486   : > { %v701_v53 = vpop.xlane.xlu1 %700 }
 0x487   : > { %v702_v54 = vsub.f32 %v697_v42, %v701_v53  ;;  %v1764_v42 = vld [vmem:[#allocation11 + $0x8] sm:$0xff]  }
 0x489   : > { %v703_v55 = vmul.f32 1.442695, %v702_v54 }
 0x48b   : > { %1773 = vpow2.f32 %v703_v55  ;;  %v1768_v55 = vld [vmem:[%s2701_s26 + $0x8] sm:$0xff]  }
 0x48e   : > { %v810_v56 = vpop.xlane.xlu0 %809 }
 0x48f   : > { %v811_v57 = vsub.f32 %v807_v48, %v810_v56 }
 0x491   : > { %v812_v58 = vmul.f32 1.442695, %v811_v57 }
 0x493   : > { %1775 = vpow2.f32 %v812_v58 }
 0x495   : > { %v1774_v59 = vpop.eup %1773 }
 0x496   : > { %v705_v60 = vsel %vm698_vm4, %v1774_v59, 0.0 }
 0x497   : > { %706 = vadd.xlane.f32.xlu0 %v705_v60  ;;  %v1769_v60 = vld [vmem:[#allocation10] sm:$0xff]  }
 0x49d   : > { %v1776_v61 = vpop.eup %1775 }
 0x49e   : > { %v814_v62 = vsel %vm698_vm4, %v1776_v61, 0.0 }
 0x49f   : > { %815 = vadd.xlane.f32.xlu1 %v814_v62  ;;  %v958_v62 = vsub.s32 4, %v2455_v8 }
 0x4ad   : > { %821 = vrot.lane.b32.xlu0 %v583_v27, %s2084_s12  ;;  %s1319_s12 = sshll.u32 %s2468_s11, 4  ;;  %s2605_s12 = int_to_ptr.vmem [resolvable:$true] %s1319_s12 }
 0x4ae   : > { %s1993_s24 = scalar_lea.vmem %s2605_s12, 512  ;;  %p2000_p13 = scmp.lt.s32.totalorder %s2605_s12, %s1998_s14 }
 0x4af   : > { %p1994_p6 = scmp.ne.s32.totalorder %s2605_s12, %s1993_s24  ;;  %p2001_p0 = scmp.lt.s32.totalorder %s1999_s27, %s1993_s24 }
 0x4b1   : > { %p1995_p12 = pnand %p1994_p6, %p2703_p9  ;;  %p2002_p2 = por %p2001_p0, %p2000_p13 }
 0x4b3   : > { %p1996_p1 = pneg %p1995_p12 }
 0x4b5   : > { %p2003_p3 = pnand %p2002_p2, %p1996_p1 }
 0x524   : > { %v707_v63 = vpop.xlane.xlu0 %706 }
 0x525   : > { %1777 = vrcp.f32 %v707_v63  ;;  %v959_v63 = vrot.slane %v2461_v10, %v958_v62 }
 0x528   : > { %v822_v4 = vpop.permute.xlu0 %821 }
 0x529   : > { %v827_v6 = vsel %vm714_vm2, %v822_v4, 0  ;;  %v1084_v4 = vrot.slane %v2461_v10, 6 }
 0x52c   : > { %v816_v1 = vpop.xlane.xlu1 %815 }
 0x52d   : > { %1779 = vrcp.f32 %v816_v1  ;;  %v963_v1 = vsub.s32 5, %v2455_v8 }
 0x52f   : > { %v1778_v2 = vpop.eup %1777 }
 0x530   : > { %v709_v3 = vmul.f32 %v1778_v2, %v1774_v59 }
 0x532   : > { %v710_v5 = vpack.c.bf16 %v709_v3, %v709_v3  ;;  %v964_v3 = vrot.slane %v2461_v10, %v963_v1 }
 0x534   : > { %1583 = vmatmul.mubr.msk.bf16.vlgmr.msra.gmra.mrb[4].mxu1 %vm698_vm4, %v710_v5 }
 0x535   : > { %1593 = vmatpush3.bf16.msra.mxu1 %v827_v6  ;;  %1594 = vmatprep.mubr.msk.bf16.mxu1 %vm2083_vm0, %v2082_v0 }
 0x536   : > { %1606 = vmatprep.subr.bf16.mxu1 %v2082_v0 }
 0x537   : > { %v1780_v7 = vpop.eup %1779 }
 0x538   : > { %v818_v9 = vmul.f32 %v1780_v7, %v1776_v61  ;;  %v1770_v61 = vld [vmem:[#allocation10 + $0x8] sm:$0xff]  }
 0x53a   : > { %v819_v11 = vpack.c.bf16 %v818_v9, %v818_v9 }
 0x53c   : > { %1595 = vmatmul.mubr.msk.bf16.vlgmr.msra.gmra.mrb[8].mxu1 %vm698_vm4, %v819_v11 }
 0x53d   : > { %1610 = vmatprep.mubr.msk.bf16.mxu1 %vm2083_vm0, %v2082_v0  ;;  %1607 = vmatpush3.bf16.msra.mxu1 %v1765_v43 }
 0x53e   : > { %1608 = vmatprep.subr.bf16.mxu1 %v2082_v0 }
 0x541   : > { %1609 = vmatpush3.bf16.msra.mxu1 %v1766_v44 }
 0x542   : > { %1622 = vmatprep.subr.bf16.mxu1 %v2082_v0 }
 0x607   : > { %v751_v12 = vpop.f32.mrb[4].mxu1 }
 0x608   : > { %v1584_v13 = vpop.f32.mrb[5].mxu1 }
 0x609   : > { %v754_v14 = vpop.f32.mrb[6].mxu1 }
 0x60a   : > { %v1585_v15 = vpop.f32.mrb[7].mxu1  ;;  %v1088_v14 = vrot.slane %v2461_v10, 7 }
 0x60f   : > { %v863_v18 = vpop.f32.mrb[8].mxu1 }
 0x610   : > { %870 = vrot.lane.b32.xlu1 %v863_v18, %s2087_s25  ;;  %v1596_v19 = vpop.f32.mrb[9].mxu1  ;;  %s2702_s25 = sld [smem:[#allocation23_spill]] }
 0x611   : > { %v866_v20 = vpop.f32.mrb[10].mxu1 }
 0x612   : > { %v1597_v21 = vpop.f32.mrb[11].mxu1 }
 0x616   : > { %s2603_s28 = scalar_lea.hbm %s2702_s25, %s1528_s29 }
 0x682   : > { %v871_v25 = vpop.permute.xlu1 %870 }
 0x683   : > { %v873_v27 = vsel %vm650_vm3, %v751_v12, %v871_v25 }
 0x684   : > { %v878_v29 = vmul.f32 %v877_v23, %v873_v27 }
 0x686   : > { %v879_v30 = vadd.f32 %v878_v29, %v2466_v26 }
 0x688   : > { %v2519_v31 = vadd.f32 %v883_v28, %v879_v30 }
 0x68a   : > { %v885_v32 = vsel %vm525_vm1, %v2519_v31, 0.0  ;;  %1522 = vst.msk [vmem:[%s2468_s11 + $0x18] sm:$0xff] %vm525_vm1, %v2519_v31  ;;  %v1119_v59 = vpack.c.bf16 %v2519_v31, %v2519_v31  ;;  %v960_v2 = vmul.f32 %v959_v63, %v2519_v31 }
 0x68b   : > { %v886_v33 = vrot.slane %v885_v32, 4 }
 0x68c   : > { %v965_v9 = vadd.f32 %v964_v3, %v960_v2 }
 0x68d   : > { %v887_v34 = vadd.f32 %v886_v33, %v885_v32 }
 0x68e   : > { %v967_v17 = vmax.f32 %v965_v9, 0.0 }
 0x68f   : > { %v888_v35 = vrot.slane %v887_v34, 2 }
 0x690   : > { %v1285_v25 = vmul.f32 %v967_v17, %v967_v17 }
 0x691   : > { %v889_v36 = vadd.f32 %v888_v35, %v887_v34 }
 0x692   : > { %v1286_v10 = vsel %vm525_vm1, %v1285_v25, 0.0 }
 0x693   : > { %v890_v37 = vrot.slane %v889_v36, 1 }
 0x695   : > { %v891_v38 = vadd.f32 %v890_v37, %v889_v36 }
 0x697   : > { %v2526_v39 = vmul.f32 0.125, %v891_v38 }
 0x699   : > { %v897_v41 = vpack.c.bf16 %v2526_v39, %v2526_v39 }
 0x69b   : > { %1603 = vmatmul.mubr.msk.bf16.vlgmr.msra.gmra.mrb[12].mxu0 %vm525_vm1, %v897_v41 }
 0x69c   : > { %1615 = vmatpush3.bf16.msra.mxu0 %v1763_v40  ;;  %1618 = vmatprep.mubr.msk.bf16.mxu0 %vm2083_vm0, %v2082_v0 }
 0x69d   : > { %1616 = vmatprep.subr.bf16.mxu0 %v2082_v0 }
 0x6a0   : > { %1617 = vmatpush3.bf16.msra.mxu0 %v1764_v42 }
 0x6a1   : > { %1630 = vmatprep.subr.bf16.mxu0 %v2082_v0 }
 0x6a3   : > { %1619 = vmatmul.mubr.msk.bf16.vlgmr.msra.gmra.mrb[16].mxu0 %vm525_vm1, %v897_v41 }
 0x6a4   : > { %1634 = vmatprep.mubr.msk.bf16.mxu0 %vm2083_vm0, %v2082_v0  ;;  %1631 = vmatpush3.bf16.msra.mxu0 %v1769_v60 }
 0x6a5   : > { %1632 = vmatprep.subr.bf16.mxu0 %v2082_v0 }
 0x6a8   : > { %1633 = vmatpush3.bf16.msra.mxu0 %v1770_v61 }
 0x76e   : > { %v950_v46 = vpop.f32.mrb[12].mxu0 }
 0x76f   : > { %v951_v47 = vadd.f32 %v950_v46, %v911_v45  ;;  %v1604_v48 = vpop.f32.mrb[13].mxu0  ;;  %v1277_v45 = vmul.f32 %v2466_v26, %v2466_v26 }
 0x770   : > { %v953_v49 = vpop.f32.mrb[14].mxu0 }
 0x771   : > { %v2541_v50 = vmax.f32 %v951_v47, 0.0  ;;  %v1605_v51 = vpop.f32.mrb[15].mxu0  ;;  %v1278_v46 = vsel %vm525_vm1, %v1277_v45, 0.0 }
 0x773   : > { %v976_v53 = vpack.c.bf16 %v2541_v50, %v2541_v50 }
 0x775   : > { %1611 = vmatmul.mubr.msk.bf16.vlgmr.msra.gmra.mrb[12].mxu1 %vm525_vm1, %v976_v53 }
 0x776   : > { %v1078_v54 = vpop.f32.mrb[16].mxu0  ;;  %1623 = vmatpush3.bf16.msra.mxu1 %v1767_v52  ;;  %1626 = vmatprep.mubr.msk.bf16.mxu1 %vm2083_vm0, %v2082_v0 }
 0x777   : > { %v1620_v56 = vpop.f32.mrb[17].mxu0  ;;  %1624 = vmatprep.subr.bf16.mxu1 %v2082_v0  ;;  %v502_v0 = vld [vmem:[%s2672_s9 + $0x8] sm:$0x7] }
 0x778   : > { %v1081_v57 = vpop.f32.mrb[18].mxu0  ;;  %v1123_v16 = vrot.slane %v502_v0, %v876_v22  ;;  %v2088_v22 = vmov 0   ;;  %v1188_v47 = vrot.slane %v502_v0, %v882_v24 }
 0x779   : > { %v1621_v58 = vpop.f32.mrb[19].mxu0  ;;  %1756 = vset.pattern.permute.xlu0 %v2088_v22 }
 0x77a   : > { %1625 = vmatpush3.bf16.msra.mxu1 %v1768_v55 }
 0x77d   : > { %1627 = vmatmul.mubr.msk.bf16.vlgmr.msra.gmra.mrb[16].mxu1 %vm525_vm1, %v1119_v59 }
 0x848   : > { %v1026_v5 = vpop.f32.mrb[12].mxu1 }
 0x849   : > { %v1079_v6 = vadd.f32 %v1078_v54, %v1026_v5  ;;  %v1612_v7 = vpop.f32.mrb[13].mxu1 }
 0x84a   : > { %v1029_v11 = vpop.f32.mrb[14].mxu1 }
 0x84b   : > { %v1086_v12 = vadd.f32 %v1084_v4, %v1079_v6  ;;  %v1613_v13 = vpop.f32.mrb[15].mxu1 }
 0x84d   : > { %v1087_v15 = vmax.f32 %v1086_v12, 0.0 }
 0x84f   : > { %v1090_v18 = vmul.f32 %v1088_v14, %v1087_v15 }
 0x850   : > { %v1173_v19 = vpop.f32.mrb[16].mxu1 }
 0x851   : > { %v1174_v20 = vadd.f32 %v1173_v19, %v1123_v16  ;;  %v1628_v21 = vpop.f32.mrb[17].mxu1  ;;  %v1092_v23 = vsel %vm1091_vm5, %v1090_v18, 0.0 }
 0x852   : > { %1093 = vadd.xlane.f32.xlu1 %v1092_v23  ;;  %v1176_v27 = vpop.f32.mrb[18].mxu1 }
 0x853   : > { %v1179_v28 = vmax.f32 %v1174_v20, 0.0  ;;  %v1629_v29 = vpop.f32.mrb[19].mxu1 }
 0x855   : > { %v1184_v30 = vpack.c.bf16 %v1179_v28, %v1179_v28 }
 0x856   : > { %1287 = vadd.xlane.f32.xlu1 %v1286_v10 }
 0x857   : > { %1635 = vmatmul.mubr.msk.bf16.vlgmr.msra.gmra.mrb[20].mxu0 %vm525_vm1, %v1184_v30 }
 0x8df   : > { %v1094_v32 = vpop.xlane.xlu1 %1093 }
 0x8e0   : > { %v1095_v33 = vadd.f32 %v1094_v32, %v502_v0 }
 0x8e2   : > { %v1096_v34 = vsub.f32 0.0, %v1095_v33 }
 0x8e3   : > { %v1288_v35 = vpop.xlane.xlu1 %1287 }
 0x8e4   : > { %v1097_v36 = vmul.f32 1.442695, %v1096_v34  ;;  %v1289_v37 = vmax.f32 %v1288_v35, 1e-24 }
 0x8e6   : > { %1781 = vpow2.f32 %v1097_v36 }
 0x8e7   : > { %1783 = vrsqrt.f32 %v1289_v37 }
 0x8f0   : > { %v1782_v38 = vpop.eup %1781 }
 0x8f1   : > { %v1784_v40 = vpop.eup %1783  ;;  %v1099_v41 = vadd.f32 1.0, %v1782_v38 }
 0x8f2   : > { %v1291_v42 = vmul.f32 %v1784_v40, %v967_v17 }
 0x8f3   : > { %1785 = vrcp.f32 %v1099_v41 }
 0x8f4   : > { %1520 = vst.msk [vmem:[%s2468_s11 + $0x8] sm:$0xff] %vm525_vm1, %v1291_v42 }
 0x8fd   : > { %v1786_v43 = vpop.eup %1785 }
 0x8fe   : > { %1103 = vperm.xlu0 %1756, %v1786_v43   ;;  %v1107_v44 = vsub.f32 1.0, %v1786_v43 }
 0x902   : > { %1110 = vperm.xlu0 %1756, %v1107_v44  }
 0x921   : > { %1279 = vadd.xlane.f32.xlu0 %v1278_v46 }
 0x92a   : > { %v1238_v48 = vpop.f32.mrb[20].mxu0 }
 0x92b   : > { %v1239_v49 = vadd.f32 %v1238_v48, %v1188_v47  ;;  %v1636_v51 = vpop.f32.mrb[21].mxu0 }
 0x92c   : > { %v1241_v52 = vpop.f32.mrb[22].mxu0 }
 0x92d   : > { %v1244_v53 = vadd.f32 %v1239_v49, %v2519_v31  ;;  %v1637_v54 = vpop.f32.mrb[23].mxu0  ;;  %v1261_v31 = vmul.f32 %v2541_v50, %v2541_v50 }
 0x92f   : > { %v1245_v55 = vsel %vm525_vm1, %v1244_v53, 0.0  ;;  %v1262_v63 = vsel %vm1091_vm5, %v1261_v31, 0.0 }
 0x930   : > { %v1246_v56 = vrot.slane %v1245_v55, 4 }
 0x932   : > { %v1247_v57 = vadd.f32 %v1246_v56, %v1245_v55 }
 0x934   : > { %v1248_v58 = vrot.slane %v1247_v57, 2 }
 0x936   : > { %v1249_v59 = vadd.f32 %v1248_v58, %v1247_v57 }
 0x938   : > { %v1250_v60 = vrot.slane %v1249_v59, 1 }
 0x93a   : > { %v1251_v61 = vadd.f32 %v1250_v60, %v1249_v59 }
 0x93c   : > { %v2583_v62 = vmul.f32 0.125, %v1251_v61 }
 0x93e   : > { %v1253_v8 = vmul.f32 %v2583_v62, %v2583_v62 }
 0x940   : > { %v1254_v24 = vsel %vm525_vm1, %v1253_v8, 0.0 }
 0x941   : > { %1255 = vadd.xlane.f32.xlu1 %v1254_v24 }
 0x945   : > { %1263 = vadd.xlane.f32.xlu1 %v1262_v63 }
 0x97d   : > { %v1104_v1 = vpop.permute.xlu0 %1103 }
 0x97e   : > { %v1106_v3 = vmul.f32 %v1104_v1, %v2526_v39 }
 0x981   : > { %v1111_v2 = vpop.permute.xlu0 %1110 }
 0x982   : > { %v1113_v4 = vmul.f32 %v1111_v2, %v2541_v50 }
 0x984   : > { %v2593_v5 = vadd.f32 %v1113_v4, %v1106_v3 }
 0x986   : > { %v1269_v6 = vmul.f32 %v2593_v5, %v2593_v5 }
 0x988   : > { %v1270_v7 = vsel %vm1091_vm5, %v1269_v6, 0.0 }
 0x989   : > { %1271 = vadd.xlane.f32.xlu0 %v1270_v7 }
 0x9ae   : > { %v1280_v9 = vpop.xlane.xlu0 %1279 }
 0x9af   : > { %v1281_v11 = vmax.f32 %v1280_v9, 1e-24 }
 0x9b1   : > { %1787 = vrsqrt.f32 %v1281_v11 }
 0x9bb   : > { %v1788_v0 = vpop.eup %1787 }
 0x9bc   : > { %v1283_v39 = vmul.f32 %v1788_v0, %v2466_v26 }
 0x9be   : > { %1284 = vst.msk [vmem:[%s2468_s11] sm:$0xff] %vm525_vm1, %v1283_v39 }
 0x9bf   : > { %2006 = shalt.err (!%p2003_p3)
}
 0x9c0   : > { %s2007_s11 = scalar_lea.hbm %s2603_s28, 512  ;;  %s2011_s21 = scalar_lea.hbm %s2702_s25, 1024 }
 0x9c1   : > { %p2008_p4 = scmp.ne.s32.totalorder %s2603_s28, %s2007_s11  ;;  %p2012_p8 = scmp.lt.u32.totalorder %s2603_s28, %s2702_s25 }
 0x9c2   : > { %p2013_p5 = scmp.lt.u32.totalorder %s2011_s21, %s2007_s11  ;;  %p2015_p6 = scmp.lt.u32.totalorder %s2007_s11, %s2603_s28 }
 0x9c3   : > { %p2009_p10 = pnand %p2008_p4, %p2703_p9 }
 0x9c4   : > { %p2014_p7 = por %p2013_p5, %p2012_p8 }
 0x9c5   : > { %p2010_p11 = pneg %p2009_p10 }
 0x9c6   : > { %p2016_p12 = por %p2015_p6, %p2014_p7 }
 0x9c8   : > { %p2017_p1 = pnand %p2016_p12, %p2010_p11 }
 0x9ca   : > { %2020 = shalt.err (!%p2017_p1)
}
 0x9cb   : > { %s2090_s24 = smov 128   ;;  %s2091_s27 = smov 8  }
 0x9cc   : > { %1664 = dma.vmem_to_hbm [thread:$0]  (%p2703_p9), %s2605_s12, 512, %s2603_s28, %s1303_s13, %s2090_s24, %s2090_s24, %s2091_s27  }
 0x9cd   : > { %p496_p13 = scmp.lt.s32.totalorder %s2173_s23, 1  ;;  %s2704_s21 = sld [smem:[#allocation22_spill]] }
 0x9ce   : > { %v1256_v26 = vpop.xlane.xlu1 %1255 }
 0x9cf   : > { %v1257_v12 = vmax.f32 %v1256_v26, 1e-24  ;;  %s2712_s23 = smov (!%p496_p13, %s2173_s23), 1 }
 0x9d0   : > { %s1493_s11 = sshll.u32 %s2712_s23, 2 }
 0x9d1   : > { %1789 = vrsqrt.f32 %v1257_v12 }
 0x9d2   : > { %v1264_v13 = vpop.xlane.xlu1 %1263 }
 0x9d3   : > { %v1265_v14 = vmax.f32 %v1264_v13, 1e-24  ;;  %s499_s30 = scalar_lea.vmem %s2704_s21, %s1493_s11 }
 0x9d5   : > { %1791 = vrsqrt.f32 %v1265_v14 }
 0x9db   : > { %v1790_v15 = vpop.eup %1789 }
 0x9dc   : > { %v1259_v16 = vmul.f32 %v1790_v15, %v2583_v62 }
 0x9de   : > { %1260 = vst.msk [vmem:[%s499_s30] sm:$0x1] %vm1091_vm5, %v1259_v16 }
 0x9df   : > { %v1792_v17 = vpop.eup %1791 }
 0x9e0   : > { %v1267_v18 = vmul.f32 %v1792_v17, %v2541_v50 }
 0x9e2   : > { %1268 = vst.msk [vmem:[%s499_s30 + $0x1] sm:$0x1] %vm1091_vm5, %v1267_v18 }
 0xa16   : > { %v1272_v19 = vpop.xlane.xlu0 %1271 }
 0xa17   : > { %v1273_v20 = vmax.f32 %v1272_v19, 1e-24 }
 0xa19   : > { %1793 = vrsqrt.f32 %v1273_v20 }
 0xa23   : > { %v1794_v21 = vpop.eup %1793 }
 0xa24   : > { %v1275_v23 = vmul.f32 %v1794_v21, %v2593_v5 }
 0xa26   : > { %1276 = vst.msk [vmem:[%s499_s30 + $0x2] sm:$0x1] %vm1091_vm5, %v1275_v23 }
 0xa27 PF: > { %s1341_s23 = sand.u32 1, %s2059_s17   ;;  %p2705_p9 = scmp.ne.s32.totalorder %s2692_s15, 0 }
 0xa28   : > { %p2706_p0 = scmp.ge.s32.totalorder %s2071_s20, 2  ;;  %s1342_s5 = scalar_lea.sflag [#allocation4], %s1341_s23 }
 0xa2a   : > { %p1690_p2 = pnand %p2706_p0, %p2705_p9 }
 0xa2c   : > { %2054 = dma.done.wait (!%p1690_p2), %s1342_s5, 512  }
 0xa2d   : > { %2056 = vsyncadd (!%p1690_p2), %s1342_s5, 4294966784  ;;  %p28_p3 = scmp.ge.s32.totalorder %s2346_s16, 4   ;;  %s2707_s17 = smov %s2063_s18 }
 0xa2e   : > { %s2708_s18 = smov %s2067_s19  ;;  %s2709_s19 = smov %s2357_s10 }
 0xa2f   : > { %s2710_s20 = smov %s2346_s16  ;;  %30 = sbr.rel (!%p28_p3) target bundleno = 13 (0xd), region = 144 }
 0xa36   :  { %1347 = vsyncpa [#allocation3], 1 }
 0xa37   :  { %1349 = vsyncpa [#allocation3 + $0x1], 1 }
 0xa38   :  { %1350 = vsyncpa [#allocation6], 1 }
 0xa39   :  { %1351 = vsyncpa [#allocation9], 1 }
 0xa3a   :  { %1352 = vsyncpa [#allocation12], 1 }
 0xa3b   :  { %1353 = vsyncpa [#allocation4], 1 }
 0xa3c   :  { %1355 = vsyncpa [#allocation4 + $0x1], 1 }

</bundles_post_ra>
